<compile_context>
chip_gen: v5e
topology: v5e:2x2
jax: 0.10.0
libtpu: 0.0.40
codegen_flags: <defaults>
</compile_context>

<pallas_src>
import functools
import math

import jax
import jax.numpy as jnp
from jax.experimental import pallas as pl
from jax.experimental.pallas import tpu as pltpu

LN_EPS = 1e-5
CFG = dict(
    vocab=100,
    hidden=32,
    heads=4,
    layers=2,
    intermediate=64,
    max_pos=16,
    pad_id=1,
    problem_attention_ratio=0.25,
    answer_attention_ratio=0.75,
)


# --------------------------------------------------------------------------- helpers
def _erf(x):
    # Abramowitz & Stegun 7.1.26 polynomial (max abs err ~1.5e-7): only exp/mul/add/where,
    # so it lowers on every TPU generation (no reliance on an erf primitive).
    a1, a2, a3, a4, a5 = (0.254829592, -0.284496736, 1.421413741,
                          -1.453152027, 1.061405429)
    p = 0.3275911
    sgn = jnp.where(x >= 0.0, 1.0, -1.0)
    ax = jnp.abs(x)
    t = 1.0 / (1.0 + p * ax)
    poly = ((((a5 * t + a4) * t + a3) * t + a2) * t + a1) * t
    return sgn * (1.0 - poly * jnp.exp(-ax * ax))


def _layernorm(h, g, b):
    mu = jnp.mean(h, axis=-1, keepdims=True)
    d = h - mu
    var = jnp.mean(d * d, axis=-1, keepdims=True)
    return d * jax.lax.rsqrt(var + LN_EPS) * g + b


# --------------------------------------------------------------------------- kernel
def _fused_forward_kernel(xemb_ref, bias_ref, embg_ref, embb_ref,
                          poolw_ref, clsw_ref, clsb_ref,
                          wqkv_ref, bqkv_ref, wo_ref, bo_ref,
                          ln1g_ref, ln1b_ref,
                          w1_ref, b1_ref, w2_ref, b2_ref,
                          ln2g_ref, ln2b_ref,
                          logits_ref, h_ref,
                          *, B, S, nH, dH, scale):
    """grid=(L,): one step per transformer layer.

    h_ref (VMEM scratch) holds the resident activations across the whole grid; the
    pool + classifier run only on the last step and write the (B, 2) logits output."""
    H = nH * dH
    f32, bf16 = jnp.float32, jnp.bfloat16
    layer = pl.program_id(0)

    # Layer 0: residual-free embedding LayerNorm initializes the resident activations.
    @pl.when(layer == 0)
    def _():
        h_ref[...] = _layernorm(xemb_ref[...], embg_ref[...], embb_ref[...])

    x = h_ref[...]                                               # (B*S, H) f32

    # ---- fused Q/K/V projection: one bf16 MXU matmul, f32 accumulation -------------
    qkv = (jnp.dot(x.astype(bf16), wqkv_ref[0],
                   preferred_element_type=f32) + bqkv_ref[0])    # (B*S, 3H) f32
    q = qkv[:, 0 * H:1 * H].reshape(B, S, H)
    k = qkv[:, 1 * H:2 * H].reshape(B, S, H)
    v = qkv[:, 2 * H:3 * H].reshape(B, S, H)

    # Attention-bias broadcast hoisted out of the per-head work (JAX does not CSE it).
    bias = jnp.broadcast_to(bias_ref[...], (B, S, S))            # (B, S, S) f32

    # ---- multi-head self-attention --------------------------------------------------
    # Heads stay in a short static loop (the Mosaic-friendly structure), but per-head
    # contexts are concatenated in-register: no VMEM scratch store + reload.
    ctx_heads = []
    for h in range(nH):
        sl = slice(h * dH, (h + 1) * dH)
        s = jnp.einsum('bqd,bkd->bqk',
                       q[:, :, sl].astype(bf16), k[:, :, sl].astype(bf16),
                       preferred_element_type=f32) * scale + bias
        s = s - jnp.max(s, axis=-1, keepdims=True)
        p = jnp.exp(s)
        p = p / jnp.sum(p, axis=-1, keepdims=True)               # exact softmax division
        ctx_heads.append(jnp.einsum('bqk,bkd->bqd',
                                    p.astype(bf16), v[:, :, sl].astype(bf16),
                                    preferred_element_type=f32))  # (B, S, dH)
    ctx = jnp.concatenate(ctx_heads, axis=-1).reshape(B * S, H)

    # ---- attention output projection + residual LayerNorm ---------------------------
    attn_out = (jnp.dot(ctx.astype(bf16), wo_ref[0],
                        preferred_element_type=f32) + bo_ref[0])
    x1 = _layernorm(attn_out + x, ln1g_ref[0], ln1b_ref[0])

    # ---- FFN: both matmuls back-to-back, exact (polynomial) erf-GELU ----------------
    mid = (jnp.dot(x1.astype(bf16), w1_ref[0],
                   preferred_element_type=f32) + b1_ref[0])
    mid = 0.5 * mid * (1.0 + _erf(mid * 0.7071067811865475))
    ffn = (jnp.dot(mid.astype(bf16), w2_ref[0],
                   preferred_element_type=f32) + b2_ref[0])
    h_new = _layernorm(ffn + x1, ln2g_ref[0], ln2b_ref[0])
    h_ref[...] = h_new

    # ---- last layer: fused problem/answer mean-pool + classifier --------------------
    @pl.when(layer == pl.num_programs(0) - 1)
    def _():
        weighted = h_new * poolw_ref[...]                        # (B*S, H) * (B*S, 1)
        comb = jnp.sum(weighted.reshape(B, S, H), axis=1)        # (B, H)
        logits_ref[...] = (jnp.dot(comb, clsw_ref[...],
                                   preferred_element_type=f32) + clsb_ref[...])


# --------------------------------------------------------------------------- params
def init_params(key, cfg):
    H, I, V, P = cfg["hidden"], cfg["intermediate"], cfg["vocab"], cfg["max_pos"]

    def nrm(k, shape):
        return 0.02 * jax.random.normal(k, shape, dtype=jnp.float32)

    keys = iter(jax.random.split(key, 64))
    params = dict(
        word_emb=nrm(next(keys), (V, H)),
        pos_emb=nrm(next(keys), (P, H)),
        type_emb=nrm(next(keys), (1, H)),
        emb_ln_g=jnp.ones((H,), jnp.float32),
        emb_ln_b=jnp.zeros((H,), jnp.float32),
        cls_w=nrm(next(keys), (H, 2)),
        cls_b=jnp.zeros((2,), jnp.float32),
        layers=[],
    )
    for _ in range(cfg["layers"]):
        params["layers"].append(dict(
            wq=nrm(next(keys), (H, H)), bq=jnp.zeros((H,), jnp.float32),
            wk=nrm(next(keys), (H, H)), bk=jnp.zeros((H,), jnp.float32),
            wv=nrm(next(keys), (H, H)), bv=jnp.zeros((H,), jnp.float32),
            wo=nrm(next(keys), (H, H)), bo=jnp.zeros((H,), jnp.float32),
            attn_ln_g=jnp.ones((H,), jnp.float32), attn_ln_b=jnp.zeros((H,), jnp.float32),
            w1=nrm(next(keys), (H, I)), b1=jnp.zeros((I,), jnp.float32),
            w2=nrm(next(keys), (I, H)), b2=jnp.zeros((H,), jnp.float32),
            ffn_ln_g=jnp.ones((H,), jnp.float32), ffn_ln_b=jnp.zeros((H,), jnp.float32),
        ))
    return params


def prepare_params(params, cfg):
    """One-time (outside jit): stack per-layer weights along a leading layer axis,
    fuse Q/K/V into a single (H, 3H) projection, and store matmul weights in bf16
    (halves per-layer weight DMA bytes).  LN params and biases stay f32."""
    H = cfg["hidden"]
    bf16 = jnp.bfloat16
    lp = params["layers"]

    def stack(name, dtype=None):
        a = jnp.stack([l[name] for l in lp], axis=0)
        return a.astype(dtype) if dtype is not None else a

    return dict(
        word_emb=params["word_emb"],
        pos_emb=params["pos_emb"],
        type_emb=params["type_emb"],
        emb_ln_g=params["emb_ln_g"].reshape(1, H),
        emb_ln_b=params["emb_ln_b"].reshape(1, H),
        cls_w=params["cls_w"],
        cls_b=params["cls_b"].reshape(1, 2),
        wqkv=jnp.stack([jnp.concatenate([l["wq"], l["wk"], l["wv"]], axis=1)
                        for l in lp], axis=0).astype(bf16),       # (L, H, 3H) bf16
        bqkv=jnp.stack([jnp.concatenate([l["bq"], l["bk"], l["bv"]])[None, :]
                        for l in lp], axis=0),                    # (L, 1, 3H) f32
        wo=stack("wo", bf16),                                     # (L, H, H) bf16
        bo=stack("bo")[:, None, :],
        ln1g=stack("attn_ln_g")[:, None, :],
        ln1b=stack("attn_ln_b")[:, None, :],
        w1=stack("w1", bf16),                                     # (L, H, I) bf16
        b1=stack("b1")[:, None, :],
        w2=stack("w2", bf16),                                     # (L, I, H) bf16
        b2=stack("b2")[:, None, :],
        ln2g=stack("ffn_ln_g")[:, None, :],
        ln2b=stack("ffn_ln_b")[:, None, :],
    )


def _pool_weights(problem_len, answer_len, S, p_ratio, a_ratio):
    """(B, S) weights w such that sum_s w[b,s] * h[b,s,:] equals
    p_ratio * mean(problem tokens) + a_ratio * mean(answer tokens)."""
    B = problem_len.shape[0]
    plen = problem_len.astype(jnp.float32).reshape(B, 1)
    alen = answer_len.astype(jnp.float32).reshape(B, 1)
    pos = jnp.arange(S, dtype=jnp.float32)[None, :]
    pmask = (pos < plen).astype(jnp.float32)
    amask = jnp.logical_and(pos >= plen, pos < plen + alen).astype(jnp.float32)
    # clamp: zero-length spans give 0 instead of PyTorch's NaN (intentional divergence)
    return (p_ratio * pmask / jnp.maximum(plen, 1.0)
            + a_ratio * amask / jnp.maximum(alen, 1.0))


# --------------------------------------------------------------------------- forward
def custom_roberta_forward(prep, input_ids, attention_mask, problem_len, answer_len):
    cfg = CFG
    B, S = input_ids.shape
    H, nH, L, I = cfg["hidden"], cfg["heads"], cfg["layers"], cfg["intermediate"]
    dH = H // nH

    # --- plain-JAX glue: embedding gathers, RoBERTa position ids, pool weights -------
    idmask = (input_ids != cfg["pad_id"]).astype(jnp.int32)
    position_ids = jnp.cumsum(idmask, axis=1) * idmask + cfg["pad_id"]
    x_emb = (prep["word_emb"][input_ids]
             + prep["pos_emb"][position_ids]
             + prep["type_emb"][0]).reshape(B * S, H).astype(jnp.float32)

    bias = ((1.0 - attention_mask.astype(jnp.float32)) * (-1e9)).reshape(B, 1, S)
    poolw = _pool_weights(problem_len, answer_len, S,
                          cfg["problem_attention_ratio"],
                          cfg["answer_attention_ratio"]).reshape(B * S, 1)

    c2 = lambda l: (0, 0)
    c3 = lambda l: (0, 0, 0)
    per = lambda l: (l, 0, 0)

    in_specs = [
        pl.BlockSpec((B * S, H), c2),          # x_emb (used at layer 0 only)
        pl.BlockSpec((B, 1, S), c3),           # additive attention bias
        pl.BlockSpec((1, H), c2),              # emb_ln_g
        pl.BlockSpec((1, H), c2),              # emb_ln_b
        pl.BlockSpec((B * S, 1), c2),          # pool weights (used at last layer only)
        pl.BlockSpec((H, 2), c2),              # classifier weight
        pl.BlockSpec((1, 2), c2),              # classifier bias
        pl.BlockSpec((1, H, 3 * H), per),      # wqkv (bf16)
        pl.BlockSpec((1, 1, 3 * H), per),      # bqkv
        pl.BlockSpec((1, H, H), per),          # wo (bf16)
        pl.BlockSpec((1, 1, H), per),          # bo
        pl.BlockSpec((1, 1, H), per),          # ln1_g
        pl.BlockSpec((1, 1, H), per),          # ln1_b
        pl.BlockSpec((1, H, I), per),          # w1 (bf16)
        pl.BlockSpec((1, 1, I), per),          # b1
        pl.BlockSpec((1, I, H), per),          # w2 (bf16)
        pl.BlockSpec((1, 1, H), per),          # b2
        pl.BlockSpec((1, 1, H), per),          # ln2_g
        pl.BlockSpec((1, 1, H), per),          # ln2_b
    ]

    # TODO(synk): at real RoBERTa sizes, add a leading "parallel" grid axis over batch /
    # sequence tiles (grid=(n_tiles, L), dimension_semantics=("parallel","arbitrary")) so
    # both v7x TensorCores get work, and budget bf16 weight double-buffering against the
    # 64 MiB VMEM.  At this toy size a single 'arbitrary' layer axis is optimal.
    logits = pl.pallas_call(
        functools.partial(_fused_forward_kernel, B=B, S=S, nH=nH, dH=dH,
                          scale=1.0 / math.sqrt(dH)),
        grid=(L,),
        in_specs=in_specs,
        out_specs=pl.BlockSpec((B, 2), c2),
        out_shape=jax.ShapeDtypeStruct((B, 2), jnp.float32),
        scratch_shapes=[pltpu.VMEM((B * S, H), jnp.float32)],    # resident activations
        compiler_params=pltpu.CompilerParams(
            dimension_semantics=("arbitrary",),
            vmem_limit_bytes=32 * 1024 * 1024),
    )(x_emb, bias,
      prep["emb_ln_g"], prep["emb_ln_b"],
      poolw, prep["cls_w"], prep["cls_b"],
      prep["wqkv"], prep["bqkv"], prep["wo"], prep["bo"],
      prep["ln1g"], prep["ln1b"],
      prep["w1"], prep["b1"], prep["w2"], prep["b2"],
      prep["ln2g"], prep["ln2b"])
    return logits


# --------------------------------------------------------------------------- main
if __name__ == "__main__":
    key = jax.random.PRNGKey(0)
    pkey, dkey = jax.random.split(key)

    B, S = 2, 8
    params = init_params(pkey, CFG)
    prep = prepare_params(params, CFG)    # weight stacking / bf16 cast ONCE, outside jit

    input_ids = jax.random.randint(dkey, (B, S), 2, CFG["vocab"], dtype=jnp.int32)
    attention_mask = jnp.ones((B, S), dtype=jnp.int32)
    problem_len = jnp.array([3, 4], dtype=jnp.int32)
    answer_len = jnp.array([4, 3], dtype=jnp.int32)

    fwd = jax.jit(custom_roberta_forward)
    logits = fwd(prep, input_ids, attention_mask, problem_len, answer_len)
    jax.block_until_ready(logits)
    assert logits.shape == (B, 2)
    # TODO(synk): dropout layers of the pretrained RoBERTa are omitted (eval semantics).
    print("KERNEL_OK")
</pallas_src>

<mosaic_0001>
module attributes {stable_mosaic.version = 11 : i64} {
  func.func @_fused_forward_kernel(%arg0: i32, %arg1: memref<16x32xf32, #tpu.memory_space<vmem>>, %arg2: memref<2x1x8xf32, #tpu.memory_space<vmem>>, %arg3: memref<1x32xf32, #tpu.memory_space<vmem>>, %arg4: memref<1x32xf32, #tpu.memory_space<vmem>>, %arg5: memref<16x1xf32, #tpu.memory_space<vmem>>, %arg6: memref<32x2xf32, #tpu.memory_space<vmem>>, %arg7: memref<1x2xf32, #tpu.memory_space<vmem>>, %arg8: memref<1x32x96xbf16, #tpu.memory_space<vmem>>, %arg9: memref<1x1x96xf32, #tpu.memory_space<vmem>>, %arg10: memref<1x32x32xbf16, #tpu.memory_space<vmem>>, %arg11: memref<1x1x32xf32, #tpu.memory_space<vmem>>, %arg12: memref<1x1x32xf32, #tpu.memory_space<vmem>>, %arg13: memref<1x1x32xf32, #tpu.memory_space<vmem>>, %arg14: memref<1x32x64xbf16, #tpu.memory_space<vmem>>, %arg15: memref<1x1x64xf32, #tpu.memory_space<vmem>>, %arg16: memref<1x64x32xbf16, #tpu.memory_space<vmem>>, %arg17: memref<1x1x32xf32, #tpu.memory_space<vmem>>, %arg18: memref<1x1x32xf32, #tpu.memory_space<vmem>>, %arg19: memref<1x1x32xf32, #tpu.memory_space<vmem>>, %arg20: memref<2x2xf32, #tpu.memory_space<vmem>>, %arg21: memref<16x32xf32, #tpu.memory_space<vmem>>) attributes {dimension_semantics = [#tpu.dimension_semantics<arbitrary>], iteration_bounds = array<i64: 2>, scalar_prefetch = 0 : i64, scratch_operands = 1 : i64, tpu.core_type = #tpu.core_type<tc>, window_params = [{pipeline_mode = #tpu.pipeline_mode<synchronous>, transform_indices = @transform_0, window_bounds = array<i64: 16, 32>}, {pipeline_mode = #tpu.pipeline_mode<synchronous>, transform_indices = @transform_1, window_bounds = array<i64: 2, 1, 8>}, {pipeline_mode = #tpu.pipeline_mode<synchronous>, transform_indices = @transform_2, window_bounds = array<i64: 1, 32>}, {pipeline_mode = #tpu.pipeline_mode<synchronous>, transform_indices = @transform_3, window_bounds = array<i64: 1, 32>}, {pipeline_mode = #tpu.pipeline_mode<synchronous>, transform_indices = @transform_4, window_bounds = array<i64: 16, 1>}, {pipeline_mode = #tpu.pipeline_mode<synchronous>, transform_indices = @transform_5, window_bounds = array<i64: 32, 2>}, {pipeline_mode = #tpu.pipeline_mode<synchronous>, transform_indices = @transform_6, window_bounds = array<i64: 1, 2>}, {transform_indices = @transform_7, window_bounds = array<i64: 1, 32, 96>}, {transform_indices = @transform_8, window_bounds = array<i64: 1, 1, 96>}, {transform_indices = @transform_9, window_bounds = array<i64: 1, 32, 32>}, {transform_indices = @transform_10, window_bounds = array<i64: 1, 1, 32>}, {transform_indices = @transform_11, window_bounds = array<i64: 1, 1, 32>}, {transform_indices = @transform_12, window_bounds = array<i64: 1, 1, 32>}, {transform_indices = @transform_13, window_bounds = array<i64: 1, 32, 64>}, {transform_indices = @transform_14, window_bounds = array<i64: 1, 1, 64>}, {transform_indices = @transform_15, window_bounds = array<i64: 1, 64, 32>}, {transform_indices = @transform_16, window_bounds = array<i64: 1, 1, 32>}, {transform_indices = @transform_17, window_bounds = array<i64: 1, 1, 32>}, {transform_indices = @transform_18, window_bounds = array<i64: 1, 1, 32>}, {pipeline_mode = #tpu.pipeline_mode<synchronous>, transform_indices = @transform_19, window_bounds = array<i64: 2, 2>}]} {
    %c0_i32 = arith.constant 0 : i32
    %0 = arith.cmpi eq, %arg0, %c0_i32 : i32
    %1 = arith.extui %0 : i1 to i32
    %c0_i32_0 = arith.constant 0 : i32
    %2 = arith.cmpi ne, %1, %c0_i32_0 : i32
    scf.if %2 {
      %c0_93 = arith.constant 0 : index
      %c0_94 = arith.constant 0 : index
      %226 = vector.load %arg1[%c0_93, %c0_94] : memref<16x32xf32, #tpu.memory_space<vmem>>, vector<16x32xf32>
      %c0_95 = arith.constant 0 : index
      %c0_96 = arith.constant 0 : index
      %227 = vector.load %arg3[%c0_95, %c0_96] : memref<1x32xf32, #tpu.memory_space<vmem>>, vector<1x32xf32>
      %c0_97 = arith.constant 0 : index
      %c0_98 = arith.constant 0 : index
      %228 = vector.load %arg4[%c0_97, %c0_98] : memref<1x32xf32, #tpu.memory_space<vmem>>, vector<1x32xf32>
      %cst_99 = arith.constant dense<0.000000e+00> : vector<16xf32>
      %229 = vector.multi_reduction <add>, %226, %cst_99 [1] : vector<16x32xf32> to vector<16xf32>
      %230 = vector.shape_cast %229 : vector<16xf32> to vector<16x1xf32>
      %cst_100 = arith.constant 3.200000e+01 : f32
      %231 = vector.broadcast %cst_100 : f32 to vector<16x1xf32>
      %232 = arith.divf %230, %231 : vector<16x1xf32>
      %233 = vector.broadcast %232 : vector<16x1xf32> to vector<16x32xf32>
      %234 = arith.subf %226, %233 : vector<16x32xf32>
      %235 = arith.mulf %234, %234 : vector<16x32xf32>
      %cst_101 = arith.constant dense<0.000000e+00> : vector<16xf32>
      %236 = vector.multi_reduction <add>, %235, %cst_101 [1] : vector<16x32xf32> to vector<16xf32>
      %237 = vector.shape_cast %236 : vector<16xf32> to vector<16x1xf32>
      %cst_102 = arith.constant 3.200000e+01 : f32
      %238 = vector.broadcast %cst_102 : f32 to vector<16x1xf32>
      %239 = arith.divf %237, %238 : vector<16x1xf32>
      %cst_103 = arith.constant 9.99999974E-6 : f32
      %240 = vector.broadcast %cst_103 : f32 to vector<16x1xf32>
      %241 = arith.addf %239, %240 : vector<16x1xf32>
      %242 = math.rsqrt %241 : vector<16x1xf32>
      %243 = vector.broadcast %242 : vector<16x1xf32> to vector<16x32xf32>
      %244 = arith.mulf %234, %243 : vector<16x32xf32>
      %245 = vector.broadcast %227 : vector<1x32xf32> to vector<16x32xf32>
      %246 = arith.mulf %244, %245 : vector<16x32xf32>
      %247 = vector.broadcast %228 : vector<1x32xf32> to vector<16x32xf32>
      %248 = arith.addf %246, %247 : vector<16x32xf32>
      %c0_104 = arith.constant 0 : index
      %c0_105 = arith.constant 0 : index
      %249 = vector.load %arg21[%c0_104, %c0_105] : memref<16x32xf32, #tpu.memory_space<vmem>>, vector<16x32xf32>
      tpu.vector_store %arg21[%c0_104, %c0_105], %248 {strides = array<i32>} : memref<16x32xf32, #tpu.memory_space<vmem>>, vector<16x32xf32>,
    } else {
    }
    %c0 = arith.constant 0 : index
    %c0_1 = arith.constant 0 : index
    %3 = vector.load %arg21[%c0, %c0_1] : memref<16x32xf32, #tpu.memory_space<vmem>>, vector<16x32xf32>
    %4 = arith.truncf %3 : vector<16x32xf32> to vector<16x32xbf16>
    %c0_2 = arith.constant 0 : index
    %c0_3 = arith.constant 0 : index
    %c0_4 = arith.constant 0 : index
    %5 = vector.load %arg8[%c0_2, %c0_3, %c0_4] : memref<1x32x96xbf16, #tpu.memory_space<vmem>>, vector<1x32x96xbf16>
    %6 = vector.shape_cast %5 : vector<1x32x96xbf16> to vector<32x96xbf16>
    %cst = arith.constant dense<0.000000e+00> : vector<16x96xf32>
    %7 = tpu.matmul %4, %6, %cst {dimension_numbers = #tpu.dot_dimension_numbers<[1], [0], [0], [1], [0, 0, 1, 1], [], []>} : vector<16x32xbf16>, vector<32x96xbf16>, vector<16x96xf32> -> vector<16x96xf32>
    %c0_5 = arith.constant 0 : index
    %c0_6 = arith.constant 0 : index
    %c0_7 = arith.constant 0 : index
    %8 = vector.load %arg9[%c0_5, %c0_6, %c0_7] : memref<1x1x96xf32, #tpu.memory_space<vmem>>, vector<1x1x96xf32>
    %9 = vector.shape_cast %8 : vector<1x1x96xf32> to vector<1x96xf32>
    %10 = vector.broadcast %9 : vector<1x96xf32> to vector<16x96xf32>
    %11 = arith.addf %7, %10 : vector<16x96xf32>
    %12 = vector.extract_strided_slice %11 {offsets = [0, 0], sizes = [16, 32], strides = [1, 1]} : vector<16x96xf32> to vector<16x32xf32>
    %13 = vector.shape_cast %12 : vector<16x32xf32> to vector<2x8x32xf32>
    %14 = vector.extract_strided_slice %11 {offsets = [0, 32], sizes = [16, 32], strides = [1, 1]} : vector<16x96xf32> to vector<16x32xf32>
    %15 = vector.shape_cast %14 : vector<16x32xf32> to vector<2x8x32xf32>
    %16 = vector.extract_strided_slice %11 {offsets = [0, 64], sizes = [16, 32], strides = [1, 1]} : vector<16x96xf32> to vector<16x32xf32>
    %17 = vector.shape_cast %16 : vector<16x32xf32> to vector<2x8x32xf32>
    %c0_8 = arith.constant 0 : index
    %c0_9 = arith.constant 0 : index
    %c0_10 = arith.constant 0 : index
    %18 = vector.load %arg2[%c0_8, %c0_9, %c0_10] : memref<2x1x8xf32, #tpu.memory_space<vmem>>, vector<2x1x8xf32>
    %19 = vector.shape_cast %18 : vector<2x1x8xf32> to vector<2x1x8xf32>
    %20 = vector.broadcast %19 : vector<2x1x8xf32> to vector<2x8x8xf32>
    %21 = vector.extract_strided_slice %13 {offsets = [0, 0, 0], sizes = [2, 8, 8], strides = [1, 1, 1]} : vector<2x8x32xf32> to vector<2x8x8xf32>
    %22 = arith.truncf %21 : vector<2x8x8xf32> to vector<2x8x8xbf16>
    %23 = vector.extract_strided_slice %15 {offsets = [0, 0, 0], sizes = [2, 8, 8], strides = [1, 1, 1]} : vector<2x8x32xf32> to vector<2x8x8xf32>
    %24 = arith.truncf %23 : vector<2x8x8xf32> to vector<2x8x8xbf16>
    "tpu.trace_start"() <{level = 10 : i32, message = "bqd,bkd->bqk"}> : () -> ()
    %cst_11 = arith.constant dense<0.000000e+00> : vector<2x8x8xf32>
    %25 = tpu.matmul %22, %24, %cst_11 {dimension_numbers = #tpu.dot_dimension_numbers<[2], [2], [1], [1], [0, 0, 0, 1, 1, 1], [0], [0]>} : vector<2x8x8xbf16>, vector<2x8x8xbf16>, vector<2x8x8xf32> -> vector<2x8x8xf32>
    "tpu.trace_stop"() : () -> ()
    %cst_12 = arith.constant 0.353553385 : f32
    %26 = vector.broadcast %cst_12 : f32 to vector<2x8x8xf32>
    %27 = arith.mulf %25, %26 : vector<2x8x8xf32>
    %28 = arith.addf %27, %20 : vector<2x8x8xf32>
    %cst_13 = arith.constant dense<0xFF800000> : vector<2x8xf32>
    %29 = vector.multi_reduction <maximumf>, %28, %cst_13 [2] : vector<2x8x8xf32> to vector<2x8xf32>
    %30 = vector.shape_cast %29 : vector<2x8xf32> to vector<2x8x1xf32>
    %31 = vector.broadcast %30 : vector<2x8x1xf32> to vector<2x8x8xf32>
    %32 = arith.subf %28, %31 : vector<2x8x8xf32>
    %33 = math.exp %32 : vector<2x8x8xf32>
    %cst_14 = arith.constant dense<0.000000e+00> : vector<2x8xf32>
    %34 = vector.multi_reduction <add>, %33, %cst_14 [2] : vector<2x8x8xf32> to vector<2x8xf32>
    %35 = vector.shape_cast %34 : vector<2x8xf32> to vector<2x8x1xf32>
    %36 = vector.broadcast %35 : vector<2x8x1xf32> to vector<2x8x8xf32>
    %37 = arith.divf %33, %36 : vector<2x8x8xf32>
    %38 = arith.truncf %37 : vector<2x8x8xf32> to vector<2x8x8xbf16>
    %39 = vector.extract_strided_slice %17 {offsets = [0, 0, 0], sizes = [2, 8, 8], strides = [1, 1, 1]} : vector<2x8x32xf32> to vector<2x8x8xf32>
    %40 = arith.truncf %39 : vector<2x8x8xf32> to vector<2x8x8xbf16>
    "tpu.trace_start"() <{level = 10 : i32, message = "bqk,bkd->bqd"}> : () -> ()
    %cst_15 = arith.constant dense<0.000000e+00> : vector<2x8x8xf32>
    %41 = tpu.matmul %38, %40, %cst_15 {dimension_numbers = #tpu.dot_dimension_numbers<[2], [1], [1], [2], [0, 0, 0, 1, 1, 2], [0], [0]>} : vector<2x8x8xbf16>, vector<2x8x8xbf16>, vector<2x8x8xf32> -> vector<2x8x8xf32>
    "tpu.trace_stop"() : () -> ()
    %42 = vector.extract_strided_slice %13 {offsets = [0, 0, 8], sizes = [2, 8, 8], strides = [1, 1, 1]} : vector<2x8x32xf32> to vector<2x8x8xf32>
    %43 = arith.truncf %42 : vector<2x8x8xf32> to vector<2x8x8xbf16>
    %44 = vector.extract_strided_slice %15 {offsets = [0, 0, 8], sizes = [2, 8, 8], strides = [1, 1, 1]} : vector<2x8x32xf32> to vector<2x8x8xf32>
    %45 = arith.truncf %44 : vector<2x8x8xf32> to vector<2x8x8xbf16>
    "tpu.trace_start"() <{level = 10 : i32, message = "bqd,bkd->bqk"}> : () -> ()
    %cst_16 = arith.constant dense<0.000000e+00> : vector<2x8x8xf32>
    %46 = tpu.matmul %43, %45, %cst_16 {dimension_numbers = #tpu.dot_dimension_numbers<[2], [2], [1], [1], [0, 0, 0, 1, 1, 1], [0], [0]>} : vector<2x8x8xbf16>, vector<2x8x8xbf16>, vector<2x8x8xf32> -> vector<2x8x8xf32>
    "tpu.trace_stop"() : () -> ()
    %cst_17 = arith.constant 0.353553385 : f32
    %47 = vector.broadcast %cst_17 : f32 to vector<2x8x8xf32>
    %48 = arith.mulf %46, %47 : vector<2x8x8xf32>
    %49 = arith.addf %48, %20 : vector<2x8x8xf32>
    %cst_18 = arith.constant dense<0xFF800000> : vector<2x8xf32>
    %50 = vector.multi_reduction <maximumf>, %49, %cst_18 [2] : vector<2x8x8xf32> to vector<2x8xf32>
    %51 = vector.shape_cast %50 : vector<2x8xf32> to vector<2x8x1xf32>
    %52 = vector.broadcast %51 : vector<2x8x1xf32> to vector<2x8x8xf32>
    %53 = arith.subf %49, %52 : vector<2x8x8xf32>
    %54 = math.exp %53 : vector<2x8x8xf32>
    %cst_19 = arith.constant dense<0.000000e+00> : vector<2x8xf32>
    %55 = vector.multi_reduction <add>, %54, %cst_19 [2] : vector<2x8x8xf32> to vector<2x8xf32>
    %56 = vector.shape_cast %55 : vector<2x8xf32> to vector<2x8x1xf32>
    %57 = vector.broadcast %56 : vector<2x8x1xf32> to vector<2x8x8xf32>
    %58 = arith.divf %54, %57 : vector<2x8x8xf32>
    %59 = arith.truncf %58 : vector<2x8x8xf32> to vector<2x8x8xbf16>
    %60 = vector.extract_strided_slice %17 {offsets = [0, 0, 8], sizes = [2, 8, 8], strides = [1, 1, 1]} : vector<2x8x32xf32> to vector<2x8x8xf32>
    %61 = arith.truncf %60 : vector<2x8x8xf32> to vector<2x8x8xbf16>
    "tpu.trace_start"() <{level = 10 : i32, message = "bqk,bkd->bqd"}> : () -> ()
    %cst_20 = arith.constant dense<0.000000e+00> : vector<2x8x8xf32>
    %62 = tpu.matmul %59, %61, %cst_20 {dimension_numbers = #tpu.dot_dimension_numbers<[2], [1], [1], [2], [0, 0, 0, 1, 1, 2], [0], [0]>} : vector<2x8x8xbf16>, vector<2x8x8xbf16>, vector<2x8x8xf32> -> vector<2x8x8xf32>
    "tpu.trace_stop"() : () -> ()
    %63 = vector.extract_strided_slice %13 {offsets = [0, 0, 16], sizes = [2, 8, 8], strides = [1, 1, 1]} : vector<2x8x32xf32> to vector<2x8x8xf32>
    %64 = arith.truncf %63 : vector<2x8x8xf32> to vector<2x8x8xbf16>
    %65 = vector.extract_strided_slice %15 {offsets = [0, 0, 16], sizes = [2, 8, 8], strides = [1, 1, 1]} : vector<2x8x32xf32> to vector<2x8x8xf32>
    %66 = arith.truncf %65 : vector<2x8x8xf32> to vector<2x8x8xbf16>
    "tpu.trace_start"() <{level = 10 : i32, message = "bqd,bkd->bqk"}> : () -> ()
    %cst_21 = arith.constant dense<0.000000e+00> : vector<2x8x8xf32>
    %67 = tpu.matmul %64, %66, %cst_21 {dimension_numbers = #tpu.dot_dimension_numbers<[2], [2], [1], [1], [0, 0, 0, 1, 1, 1], [0], [0]>} : vector<2x8x8xbf16>, vector<2x8x8xbf16>, vector<2x8x8xf32> -> vector<2x8x8xf32>
    "tpu.trace_stop"() : () -> ()
    %cst_22 = arith.constant 0.353553385 : f32
    %68 = vector.broadcast %cst_22 : f32 to vector<2x8x8xf32>
    %69 = arith.mulf %67, %68 : vector<2x8x8xf32>
    %70 = arith.addf %69, %20 : vector<2x8x8xf32>
    %cst_23 = arith.constant dense<0xFF800000> : vector<2x8xf32>
    %71 = vector.multi_reduction <maximumf>, %70, %cst_23 [2] : vector<2x8x8xf32> to vector<2x8xf32>
    %72 = vector.shape_cast %71 : vector<2x8xf32> to vector<2x8x1xf32>
    %73 = vector.broadcast %72 : vector<2x8x1xf32> to vector<2x8x8xf32>
    %74 = arith.subf %70, %73 : vector<2x8x8xf32>
    %75 = math.exp %74 : vector<2x8x8xf32>
    %cst_24 = arith.constant dense<0.000000e+00> : vector<2x8xf32>
    %76 = vector.multi_reduction <add>, %75, %cst_24 [2] : vector<2x8x8xf32> to vector<2x8xf32>
    %77 = vector.shape_cast %76 : vector<2x8xf32> to vector<2x8x1xf32>
    %78 = vector.broadcast %77 : vector<2x8x1xf32> to vector<2x8x8xf32>
    %79 = arith.divf %75, %78 : vector<2x8x8xf32>
    %80 = arith.truncf %79 : vector<2x8x8xf32> to vector<2x8x8xbf16>
    %81 = vector.extract_strided_slice %17 {offsets = [0, 0, 16], sizes = [2, 8, 8], strides = [1, 1, 1]} : vector<2x8x32xf32> to vector<2x8x8xf32>
    %82 = arith.truncf %81 : vector<2x8x8xf32> to vector<2x8x8xbf16>
    "tpu.trace_start"() <{level = 10 : i32, message = "bqk,bkd->bqd"}> : () -> ()
    %cst_25 = arith.constant dense<0.000000e+00> : vector<2x8x8xf32>
    %83 = tpu.matmul %80, %82, %cst_25 {dimension_numbers = #tpu.dot_dimension_numbers<[2], [1], [1], [2], [0, 0, 0, 1, 1, 2], [0], [0]>} : vector<2x8x8xbf16>, vector<2x8x8xbf16>, vector<2x8x8xf32> -> vector<2x8x8xf32>
    "tpu.trace_stop"() : () -> ()
    %84 = vector.extract_strided_slice %13 {offsets = [0, 0, 24], sizes = [2, 8, 8], strides = [1, 1, 1]} : vector<2x8x32xf32> to vector<2x8x8xf32>
    %85 = arith.truncf %84 : vector<2x8x8xf32> to vector<2x8x8xbf16>
    %86 = vector.extract_strided_slice %15 {offsets = [0, 0, 24], sizes = [2, 8, 8], strides = [1, 1, 1]} : vector<2x8x32xf32> to vector<2x8x8xf32>
    %87 = arith.truncf %86 : vector<2x8x8xf32> to vector<2x8x8xbf16>
    "tpu.trace_start"() <{level = 10 : i32, message = "bqd,bkd->bqk"}> : () -> ()
    %cst_26 = arith.constant dense<0.000000e+00> : vector<2x8x8xf32>
    %88 = tpu.matmul %85, %87, %cst_26 {dimension_numbers = #tpu.dot_dimension_numbers<[2], [2], [1], [1], [0, 0, 0, 1, 1, 1], [0], [0]>} : vector<2x8x8xbf16>, vector<2x8x8xbf16>, vector<2x8x8xf32> -> vector<2x8x8xf32>
    "tpu.trace_stop"() : () -> ()
    %cst_27 = arith.constant 0.353553385 : f32
    %89 = vector.broadcast %cst_27 : f32 to vector<2x8x8xf32>
    %90 = arith.mulf %88, %89 : vector<2x8x8xf32>
    %91 = arith.addf %90, %20 : vector<2x8x8xf32>
    %cst_28 = arith.constant dense<0xFF800000> : vector<2x8xf32>
    %92 = vector.multi_reduction <maximumf>, %91, %cst_28 [2] : vector<2x8x8xf32> to vector<2x8xf32>
    %93 = vector.shape_cast %92 : vector<2x8xf32> to vector<2x8x1xf32>
    %94 = vector.broadcast %93 : vector<2x8x1xf32> to vector<2x8x8xf32>
    %95 = arith.subf %91, %94 : vector<2x8x8xf32>
    %96 = math.exp %95 : vector<2x8x8xf32>
    %cst_29 = arith.constant dense<0.000000e+00> : vector<2x8xf32>
    %97 = vector.multi_reduction <add>, %96, %cst_29 [2] : vector<2x8x8xf32> to vector<2x8xf32>
    %98 = vector.shape_cast %97 : vector<2x8xf32> to vector<2x8x1xf32>
    %99 = vector.broadcast %98 : vector<2x8x1xf32> to vector<2x8x8xf32>
    %100 = arith.divf %96, %99 : vector<2x8x8xf32>
    %101 = arith.truncf %100 : vector<2x8x8xf32> to vector<2x8x8xbf16>
    %102 = vector.extract_strided_slice %17 {offsets = [0, 0, 24], sizes = [2, 8, 8], strides = [1, 1, 1]} : vector<2x8x32xf32> to vector<2x8x8xf32>
    %103 = arith.truncf %102 : vector<2x8x8xf32> to vector<2x8x8xbf16>
    "tpu.trace_start"() <{level = 10 : i32, message = "bqk,bkd->bqd"}> : () -> ()
    %cst_30 = arith.constant dense<0.000000e+00> : vector<2x8x8xf32>
    %104 = tpu.matmul %101, %103, %cst_30 {dimension_numbers = #tpu.dot_dimension_numbers<[2], [1], [1], [2], [0, 0, 0, 1, 1, 2], [0], [0]>} : vector<2x8x8xbf16>, vector<2x8x8xbf16>, vector<2x8x8xf32> -> vector<2x8x8xf32>
    "tpu.trace_stop"() : () -> ()
    %105 = tpu.concatenate %41, %62, %83, %104 in 2 : vector<2x8x8xf32>, vector<2x8x8xf32>, vector<2x8x8xf32>, vector<2x8x8xf32> -> vector<2x8x32xf32>
    %106 = vector.shape_cast %105 : vector<2x8x32xf32> to vector<16x32xf32>
    %107 = arith.truncf %106 : vector<16x32xf32> to vector<16x32xbf16>
    %c0_31 = arith.constant 0 : index
    %c0_32 = arith.constant 0 : index
    %c0_33 = arith.constant 0 : index
    %108 = vector.load %arg10[%c0_31, %c0_32, %c0_33] : memref<1x32x32xbf16, #tpu.memory_space<vmem>>, vector<1x32x32xbf16>
    %109 = vector.shape_cast %108 : vector<1x32x32xbf16> to vector<32x32xbf16>
    %cst_34 = arith.constant dense<0.000000e+00> : vector<16x32xf32>
    %110 = tpu.matmul %107, %109, %cst_34 {dimension_numbers = #tpu.dot_dimension_numbers<[1], [0], [0], [1], [0, 0, 1, 1], [], []>} : vector<16x32xbf16>, vector<32x32xbf16>, vector<16x32xf32> -> vector<16x32xf32>
    %c0_35 = arith.constant 0 : index
    %c0_36 = arith.constant 0 : index
    %c0_37 = arith.constant 0 : index
    %111 = vector.load %arg11[%c0_35, %c0_36, %c0_37] : memref<1x1x32xf32, #tpu.memory_space<vmem>>, vector<1x1x32xf32>
    %112 = vector.shape_cast %111 : vector<1x1x32xf32> to vector<1x32xf32>
    %113 = vector.broadcast %112 : vector<1x32xf32> to vector<16x32xf32>
    %114 = arith.addf %110, %113 : vector<16x32xf32>
    %115 = arith.addf %114, %3 : vector<16x32xf32>
    %c0_38 = arith.constant 0 : index
    %c0_39 = arith.constant 0 : index
    %c0_40 = arith.constant 0 : index
    %116 = vector.load %arg12[%c0_38, %c0_39, %c0_40] : memref<1x1x32xf32, #tpu.memory_space<vmem>>, vector<1x1x32xf32>
    %117 = vector.shape_cast %116 : vector<1x1x32xf32> to vector<1x32xf32>
    %c0_41 = arith.constant 0 : index
    %c0_42 = arith.constant 0 : index
    %c0_43 = arith.constant 0 : index
    %118 = vector.load %arg13[%c0_41, %c0_42, %c0_43] : memref<1x1x32xf32, #tpu.memory_space<vmem>>, vector<1x1x32xf32>
    %119 = vector.shape_cast %118 : vector<1x1x32xf32> to vector<1x32xf32>
    %cst_44 = arith.constant dense<0.000000e+00> : vector<16xf32>
    %120 = vector.multi_reduction <add>, %115, %cst_44 [1] : vector<16x32xf32> to vector<16xf32>
    %121 = vector.shape_cast %120 : vector<16xf32> to vector<16x1xf32>
    %cst_45 = arith.constant 3.200000e+01 : f32
    %122 = vector.broadcast %cst_45 : f32 to vector<16x1xf32>
    %123 = arith.divf %121, %122 : vector<16x1xf32>
    %124 = vector.broadcast %123 : vector<16x1xf32> to vector<16x32xf32>
    %125 = arith.subf %115, %124 : vector<16x32xf32>
    %126 = arith.mulf %125, %125 : vector<16x32xf32>
    %cst_46 = arith.constant dense<0.000000e+00> : vector<16xf32>
    %127 = vector.multi_reduction <add>, %126, %cst_46 [1] : vector<16x32xf32> to vector<16xf32>
    %128 = vector.shape_cast %127 : vector<16xf32> to vector<16x1xf32>
    %cst_47 = arith.constant 3.200000e+01 : f32
    %129 = vector.broadcast %cst_47 : f32 to vector<16x1xf32>
    %130 = arith.divf %128, %129 : vector<16x1xf32>
    %cst_48 = arith.constant 9.99999974E-6 : f32
    %131 = vector.broadcast %cst_48 : f32 to vector<16x1xf32>
    %132 = arith.addf %130, %131 : vector<16x1xf32>
    %133 = math.rsqrt %132 : vector<16x1xf32>
    %134 = vector.broadcast %133 : vector<16x1xf32> to vector<16x32xf32>
    %135 = arith.mulf %125, %134 : vector<16x32xf32>
    %136 = vector.broadcast %117 : vector<1x32xf32> to vector<16x32xf32>
    %137 = arith.mulf %135, %136 : vector<16x32xf32>
    %138 = vector.broadcast %119 : vector<1x32xf32> to vector<16x32xf32>
    %139 = arith.addf %137, %138 : vector<16x32xf32>
    %140 = arith.truncf %139 : vector<16x32xf32> to vector<16x32xbf16>
    %c0_49 = arith.constant 0 : index
    %c0_50 = arith.constant 0 : index
    %c0_51 = arith.constant 0 : index
    %141 = vector.load %arg14[%c0_49, %c0_50, %c0_51] : memref<1x32x64xbf16, #tpu.memory_space<vmem>>, vector<1x32x64xbf16>
    %142 = vector.shape_cast %141 : vector<1x32x64xbf16> to vector<32x64xbf16>
    %cst_52 = arith.constant dense<0.000000e+00> : vector<16x64xf32>
    %143 = tpu.matmul %140, %142, %cst_52 {dimension_numbers = #tpu.dot_dimension_numbers<[1], [0], [0], [1], [0, 0, 1, 1], [], []>} : vector<16x32xbf16>, vector<32x64xbf16>, vector<16x64xf32> -> vector<16x64xf32>
    %c0_53 = arith.constant 0 : index
    %c0_54 = arith.constant 0 : index
    %c0_55 = arith.constant 0 : index
    %144 = vector.load %arg15[%c0_53, %c0_54, %c0_55] : memref<1x1x64xf32, #tpu.memory_space<vmem>>, vector<1x1x64xf32>
    %145 = vector.shape_cast %144 : vector<1x1x64xf32> to vector<1x64xf32>
    %146 = vector.broadcast %145 : vector<1x64xf32> to vector<16x64xf32>
    %147 = arith.addf %143, %146 : vector<16x64xf32>
    %cst_56 = arith.constant 5.000000e-01 : f32
    %148 = vector.broadcast %cst_56 : f32 to vector<16x64xf32>
    %149 = arith.mulf %148, %147 : vector<16x64xf32>
    %cst_57 = arith.constant 0.707106769 : f32
    %150 = vector.broadcast %cst_57 : f32 to vector<16x64xf32>
    %151 = arith.mulf %147, %150 : vector<16x64xf32>
    %cst_58 = arith.constant 0.000000e+00 : f32
    %152 = vector.broadcast %cst_58 : f32 to vector<16x64xf32>
    %153 = arith.cmpf oge, %151, %152 : vector<16x64xf32>
    %cst_59 = arith.constant 1.000000e+00 : f32
    %cst_60 = arith.constant -1.000000e+00 : f32
    %154 = vector.broadcast %cst_59 : f32 to vector<16x64xf32>
    %155 = vector.broadcast %cst_60 : f32 to vector<16x64xf32>
    %156 = arith.select %153, %154, %155 : vector<16x64xi1>, vector<16x64xf32>
    %157 = math.absf %151 : vector<16x64xf32>
    %cst_61 = arith.constant 0.327591091 : f32
    %158 = vector.broadcast %cst_61 : f32 to vector<16x64xf32>
    %159 = arith.mulf %158, %157 : vector<16x64xf32>
    %cst_62 = arith.constant 1.000000e+00 : f32
    %160 = vector.broadcast %cst_62 : f32 to vector<16x64xf32>
    %161 = arith.addf %160, %159 : vector<16x64xf32>
    %cst_63 = arith.constant 1.000000e+00 : f32
    %162 = vector.broadcast %cst_63 : f32 to vector<16x64xf32>
    %163 = arith.divf %162, %161 : vector<16x64xf32>
    %cst_64 = arith.constant 1.06140542 : f32
    %164 = vector.broadcast %cst_64 : f32 to vector<16x64xf32>
    %165 = arith.mulf %164, %163 : vector<16x64xf32>
    %cst_65 = arith.constant -1.45315206 : f32
    %166 = vector.broadcast %cst_65 : f32 to vector<16x64xf32>
    %167 = arith.addf %165, %166 : vector<16x64xf32>
    %168 = arith.mulf %167, %163 : vector<16x64xf32>
    %cst_66 = arith.constant 1.42141378 : f32
    %169 = vector.broadcast %cst_66 : f32 to vector<16x64xf32>
    %170 = arith.addf %168, %169 : vector<16x64xf32>
    %171 = arith.mulf %170, %163 : vector<16x64xf32>
    %cst_67 = arith.constant -0.284496725 : f32
    %172 = vector.broadcast %cst_67 : f32 to vector<16x64xf32>
    %173 = arith.addf %171, %172 : vector<16x64xf32>
    %174 = arith.mulf %173, %163 : vector<16x64xf32>
    %cst_68 = arith.constant 0.254829586 : f32
    %175 = vector.broadcast %cst_68 : f32 to vector<16x64xf32>
    %176 = arith.addf %174, %175 : vector<16x64xf32>
    %177 = arith.mulf %176, %163 : vector<16x64xf32>
    %cst_69 = arith.constant 0.000000e+00 : f32
    %178 = vector.broadcast %cst_69 : f32 to vector<16x64xf32>
    %179 = arith.subf %178, %157 : vector<16x64xf32>
    %180 = arith.mulf %179, %157 : vector<16x64xf32>
    %181 = math.exp %180 : vector<16x64xf32>
    %182 = arith.mulf %177, %181 : vector<16x64xf32>
    %cst_70 = arith.constant 1.000000e+00 : f32
    %183 = vector.broadcast %cst_70 : f32 to vector<16x64xf32>
    %184 = arith.subf %183, %182 : vector<16x64xf32>
    %185 = arith.mulf %156, %184 : vector<16x64xf32>
    %cst_71 = arith.constant 1.000000e+00 : f32
    %186 = vector.broadcast %cst_71 : f32 to vector<16x64xf32>
    %187 = arith.addf %186, %185 : vector<16x64xf32>
    %188 = arith.mulf %149, %187 : vector<16x64xf32>
    %189 = arith.truncf %188 : vector<16x64xf32> to vector<16x64xbf16>
    %c0_72 = arith.constant 0 : index
    %c0_73 = arith.constant 0 : index
    %c0_74 = arith.constant 0 : index
    %190 = vector.load %arg16[%c0_72, %c0_73, %c0_74] : memref<1x64x32xbf16, #tpu.memory_space<vmem>>, vector<1x64x32xbf16>
    %191 = vector.shape_cast %190 : vector<1x64x32xbf16> to vector<64x32xbf16>
    %cst_75 = arith.constant dense<0.000000e+00> : vector<16x32xf32>
    %192 = tpu.matmul %189, %191, %cst_75 {dimension_numbers = #tpu.dot_dimension_numbers<[1], [0], [0], [1], [0, 0, 1, 1], [], []>} : vector<16x64xbf16>, vector<64x32xbf16>, vector<16x32xf32> -> vector<16x32xf32>
    %c0_76 = arith.constant 0 : index
    %c0_77 = arith.constant 0 : index
    %c0_78 = arith.constant 0 : index
    %193 = vector.load %arg17[%c0_76, %c0_77, %c0_78] : memref<1x1x32xf32, #tpu.memory_space<vmem>>, vector<1x1x32xf32>
    %194 = vector.shape_cast %193 : vector<1x1x32xf32> to vector<1x32xf32>
    %195 = vector.broadcast %194 : vector<1x32xf32> to vector<16x32xf32>
    %196 = arith.addf %192, %195 : vector<16x32xf32>
    %197 = arith.addf %196, %139 : vector<16x32xf32>
    %c0_79 = arith.constant 0 : index
    %c0_80 = arith.constant 0 : index
    %c0_81 = arith.constant 0 : index
    %198 = vector.load %arg18[%c0_79, %c0_80, %c0_81] : memref<1x1x32xf32, #tpu.memory_space<vmem>>, vector<1x1x32xf32>
    %199 = vector.shape_cast %198 : vector<1x1x32xf32> to vector<1x32xf32>
    %c0_82 = arith.constant 0 : index
    %c0_83 = arith.constant 0 : index
    %c0_84 = arith.constant 0 : index
    %200 = vector.load %arg19[%c0_82, %c0_83, %c0_84] : memref<1x1x32xf32, #tpu.memory_space<vmem>>, vector<1x1x32xf32>
    %201 = vector.shape_cast %200 : vector<1x1x32xf32> to vector<1x32xf32>
    %cst_85 = arith.constant dense<0.000000e+00> : vector<16xf32>
    %202 = vector.multi_reduction <add>, %197, %cst_85 [1] : vector<16x32xf32> to vector<16xf32>
    %203 = vector.shape_cast %202 : vector<16xf32> to vector<16x1xf32>
    %cst_86 = arith.constant 3.200000e+01 : f32
    %204 = vector.broadcast %cst_86 : f32 to vector<16x1xf32>
    %205 = arith.divf %203, %204 : vector<16x1xf32>
    %206 = vector.broadcast %205 : vector<16x1xf32> to vector<16x32xf32>
    %207 = arith.subf %197, %206 : vector<16x32xf32>
    %208 = arith.mulf %207, %207 : vector<16x32xf32>
    %cst_87 = arith.constant dense<0.000000e+00> : vector<16xf32>
    %209 = vector.multi_reduction <add>, %208, %cst_87 [1] : vector<16x32xf32> to vector<16xf32>
    %210 = vector.shape_cast %209 : vector<16xf32> to vector<16x1xf32>
    %cst_88 = arith.constant 3.200000e+01 : f32
    %211 = vector.broadcast %cst_88 : f32 to vector<16x1xf32>
    %212 = arith.divf %210, %211 : vector<16x1xf32>
    %cst_89 = arith.constant 9.99999974E-6 : f32
    %213 = vector.broadcast %cst_89 : f32 to vector<16x1xf32>
    %214 = arith.addf %212, %213 : vector<16x1xf32>
    %215 = math.rsqrt %214 : vector<16x1xf32>
    %216 = vector.broadcast %215 : vector<16x1xf32> to vector<16x32xf32>
    %217 = arith.mulf %207, %216 : vector<16x32xf32>
    %218 = vector.broadcast %199 : vector<1x32xf32> to vector<16x32xf32>
    %219 = arith.mulf %217, %218 : vector<16x32xf32>
    %220 = vector.broadcast %201 : vector<1x32xf32> to vector<16x32xf32>
    %221 = arith.addf %219, %220 : vector<16x32xf32>
    %c0_90 = arith.constant 0 : index
    %c0_91 = arith.constant 0 : index
    %222 = vector.load %arg21[%c0_90, %c0_91] : memref<16x32xf32, #tpu.memory_space<vmem>>, vector<16x32xf32>
    tpu.vector_store %arg21[%c0_90, %c0_91], %221 {strides = array<i32>} : memref<16x32xf32, #tpu.memory_space<vmem>>, vector<16x32xf32>,
    %c1_i32 = arith.constant 1 : i32
    %223 = arith.cmpi eq, %arg0, %c1_i32 : i32
    %224 = arith.extui %223 : i1 to i32
    %c0_i32_92 = arith.constant 0 : i32
    %225 = arith.cmpi ne, %224, %c0_i32_92 : i32
    scf.if %225 {
      %c0_93 = arith.constant 0 : index
      %c0_94 = arith.constant 0 : index
      %226 = vector.load %arg5[%c0_93, %c0_94] : memref<16x1xf32, #tpu.memory_space<vmem>>, vector<16x1xf32>
      %227 = vector.broadcast %226 : vector<16x1xf32> to vector<16x32xf32>
      %228 = arith.mulf %221, %227 : vector<16x32xf32>
      %229 = vector.shape_cast %228 : vector<16x32xf32> to vector<2x8x32xf32>
      %cst_95 = arith.constant dense<0.000000e+00> : vector<2x32xf32>
      %230 = vector.multi_reduction <add>, %229, %cst_95 [1] : vector<2x8x32xf32> to vector<2x32xf32>
      %c0_96 = arith.constant 0 : index
      %c0_97 = arith.constant 0 : index
      %231 = vector.load %arg6[%c0_96, %c0_97] : memref<32x2xf32, #tpu.memory_space<vmem>>, vector<32x2xf32>
      %cst_98 = arith.constant dense<0.000000e+00> : vector<2x2xf32>
      %232 = tpu.matmul %230, %231, %cst_98 {dimension_numbers = #tpu.dot_dimension_numbers<[1], [0], [0], [1], [0, 0, 1, 1], [], []>} : vector<2x32xf32>, vector<32x2xf32>, vector<2x2xf32> -> vector<2x2xf32>
      %c0_99 = arith.constant 0 : index
      %c0_100 = arith.constant 0 : index
      %233 = vector.load %arg7[%c0_99, %c0_100] : memref<1x2xf32, #tpu.memory_space<vmem>>, vector<1x2xf32>
      %234 = vector.broadcast %233 : vector<1x2xf32> to vector<2x2xf32>
      %235 = arith.addf %232, %234 : vector<2x2xf32>
      %c0_101 = arith.constant 0 : index
      %c0_102 = arith.constant 0 : index
      %236 = vector.load %arg20[%c0_101, %c0_102] : memref<2x2xf32, #tpu.memory_space<vmem>>, vector<2x2xf32>
      tpu.vector_store %arg20[%c0_101, %c0_102], %235 {strides = array<i32>} : memref<2x2xf32, #tpu.memory_space<vmem>>, vector<2x2xf32>,
    } else {
    }
    return
  }
  func.func @transform_0(%arg0: i32) -> (i32, i32) {
    %c0_i32 = arith.constant 0 : i32
    %c0_i32_0 = arith.constant 0 : i32
    %c0_i32_1 = arith.constant 0 : i32
    return %c0_i32, %c0_i32_0 : i32, i32
  }
  func.func @transform_1(%arg0: i32) -> (i32, i32, i32) {
    %c0_i32 = arith.constant 0 : i32
    %c0_i32_0 = arith.constant 0 : i32
    %c0_i32_1 = arith.constant 0 : i32
    %c0_i32_2 = arith.constant 0 : i32
    return %c0_i32, %c0_i32_0, %c0_i32_1 : i32, i32, i32
  }
  func.func @transform_2(%arg0: i32) -> (i32, i32) {
    %c0_i32 = arith.constant 0 : i32
    %c0_i32_0 = arith.constant 0 : i32
    %c0_i32_1 = arith.constant 0 : i32
    return %c0_i32, %c0_i32_0 : i32, i32
  }
  func.func @transform_3(%arg0: i32) -> (i32, i32) {
    %c0_i32 = arith.constant 0 : i32
    %c0_i32_0 = arith.constant 0 : i32
    %c0_i32_1 = arith.constant 0 : i32
    return %c0_i32, %c0_i32_0 : i32, i32
  }
  func.func @transform_4(%arg0: i32) -> (i32, i32) {
    %c0_i32 = arith.constant 0 : i32
    %c0_i32_0 = arith.constant 0 : i32
    %c0_i32_1 = arith.constant 0 : i32
    return %c0_i32, %c0_i32_0 : i32, i32
  }
  func.func @transform_5(%arg0: i32) -> (i32, i32) {
    %c0_i32 = arith.constant 0 : i32
    %c0_i32_0 = arith.constant 0 : i32
    %c0_i32_1 = arith.constant 0 : i32
    return %c0_i32, %c0_i32_0 : i32, i32
  }
  func.func @transform_6(%arg0: i32) -> (i32, i32) {
    %c0_i32 = arith.constant 0 : i32
    %c0_i32_0 = arith.constant 0 : i32
    %c0_i32_1 = arith.constant 0 : i32
    return %c0_i32, %c0_i32_0 : i32, i32
  }
  func.func @transform_7(%arg0: i32) -> (i32, i32, i32) {
    %c0_i32 = arith.constant 0 : i32
    %c0_i32_0 = arith.constant 0 : i32
    %c0_i32_1 = arith.constant 0 : i32
    return %arg0, %c0_i32, %c0_i32_0 : i32, i32, i32
  }
  func.func @transform_8(%arg0: i32) -> (i32, i32, i32) {
    %c0_i32 = arith.constant 0 : i32
    %c0_i32_0 = arith.constant 0 : i32
    %c0_i32_1 = arith.constant 0 : i32
    return %arg0, %c0_i32, %c0_i32_0 : i32, i32, i32
  }
  func.func @transform_9(%arg0: i32) -> (i32, i32, i32) {
    %c0_i32 = arith.constant 0 : i32
    %c0_i32_0 = arith.constant 0 : i32
    %c0_i32_1 = arith.constant 0 : i32
    return %arg0, %c0_i32, %c0_i32_0 : i32, i32, i32
  }
  func.func @transform_10(%arg0: i32) -> (i32, i32, i32) {
    %c0_i32 = arith.constant 0 : i32
    %c0_i32_0 = arith.constant 0 : i32
    %c0_i32_1 = arith.constant 0 : i32
    return %arg0, %c0_i32, %c0_i32_0 : i32, i32, i32
  }
  func.func @transform_11(%arg0: i32) -> (i32, i32, i32) {
    %c0_i32 = arith.constant 0 : i32
    %c0_i32_0 = arith.constant 0 : i32
    %c0_i32_1 = arith.constant 0 : i32
    return %arg0, %c0_i32, %c0_i32_0 : i32, i32, i32
  }
  func.func @transform_12(%arg0: i32) -> (i32, i32, i32) {
    %c0_i32 = arith.constant 0 : i32
    %c0_i32_0 = arith.constant 0 : i32
    %c0_i32_1 = arith.constant 0 : i32
    return %arg0, %c0_i32, %c0_i32_0 : i32, i32, i32
  }
  func.func @transform_13(%arg0: i32) -> (i32, i32, i32) {
    %c0_i32 = arith.constant 0 : i32
    %c0_i32_0 = arith.constant 0 : i32
    %c0_i32_1 = arith.constant 0 : i32
    return %arg0, %c0_i32, %c0_i32_0 : i32, i32, i32
  }
  func.func @transform_14(%arg0: i32) -> (i32, i32, i32) {
    %c0_i32 = arith.constant 0 : i32
    %c0_i32_0 = arith.constant 0 : i32
    %c0_i32_1 = arith.constant 0 : i32
    return %arg0, %c0_i32, %c0_i32_0 : i32, i32, i32
  }
  func.func @transform_15(%arg0: i32) -> (i32, i32, i32) {
    %c0_i32 = arith.constant 0 : i32
    %c0_i32_0 = arith.constant 0 : i32
    %c0_i32_1 = arith.constant 0 : i32
    return %arg0, %c0_i32, %c0_i32_0 : i32, i32, i32
  }
  func.func @transform_16(%arg0: i32) -> (i32, i32, i32) {
    %c0_i32 = arith.constant 0 : i32
    %c0_i32_0 = arith.constant 0 : i32
    %c0_i32_1 = arith.constant 0 : i32
    return %arg0, %c0_i32, %c0_i32_0 : i32, i32, i32
  }
  func.func @transform_17(%arg0: i32) -> (i32, i32, i32) {
    %c0_i32 = arith.constant 0 : i32
    %c0_i32_0 = arith.constant 0 : i32
    %c0_i32_1 = arith.constant 0 : i32
    return %arg0, %c0_i32, %c0_i32_0 : i32, i32, i32
  }
  func.func @transform_18(%arg0: i32) -> (i32, i32, i32) {
    %c0_i32 = arith.constant 0 : i32
    %c0_i32_0 = arith.constant 0 : i32
    %c0_i32_1 = arith.constant 0 : i32
    return %arg0, %c0_i32, %c0_i32_0 : i32, i32, i32
  }
  func.func @transform_19(%arg0: i32) -> (i32, i32) {
    %c0_i32 = arith.constant 0 : i32
    %c0_i32_0 = arith.constant 0 : i32
    %c0_i32_1 = arith.constant 0 : i32
    return %c0_i32, %c0_i32_0 : i32, i32
  }
}

</mosaic_0001>

<bundles_post_ra>
// kernel: custom_roberta_forward.1
= control target key start
LH: loop header
LB: loop body
LE: loop exit
PB: predicated region body
PF: predicated region fallthrough
CT: control target
= control target key end

     0   :  { %s2774_s0 = inlined_call_operand.vmem [shape: f32[16,32], index: 0, kind: input, shape index: {}]   ;;  %s2775_s1 = inlined_call_operand.vmem [shape: f32[2,1,8], index: 1, kind: input, shape index: {}]   ;;  %s2776_s2 = inlined_call_operand.vmem [shape: f32[1,32], index: 2, kind: input, shape index: {}]   ;;  %s2777_s3 = inlined_call_operand.vmem [shape: f32[1,32], index: 3, kind: input, shape index: {}]   ;;  %s2778_s4 = inlined_call_operand.vmem [shape: f32[16,1], index: 4, kind: input, shape index: {}]   ;;  %s2779_s5 = inlined_call_operand.vmem [shape: f32[32,2], index: 5, kind: input, shape index: {}]   ;;  %s2780_s6 = inlined_call_operand.vmem [shape: f32[1,2], index: 6, kind: input, shape index: {}]   ;;  %s2781_s7 = inlined_call_operand.vmem [shape: bf16[2,32,96], index: 7, kind: input, shape index: {}]   ;;  %s2782_s8 = inlined_call_operand.vmem [shape: f32[2,1,96], index: 8, kind: input, shape index: {}]   ;;  %s2783_s9 = inlined_call_operand.vmem [shape: bf16[2,32,32], index: 9, kind: input, shape index: {}]   ;;  %s2784_s10 = inlined_call_operand.vmem [shape: f32[2,1,32], index: 10, kind: input, shape index: {}]   ;;  %s2785_s11 = inlined_call_operand.vmem [shape: f32[2,1,32], index: 11, kind: input, shape index: {}]   ;;  %s2786_s12 = inlined_call_operand.vmem [shape: f32[2,1,32], index: 12, kind: input, shape index: {}]   ;;  %s2787_s13 = inlined_call_operand.vmem [shape: bf16[2,32,64], index: 13, kind: input, shape index: {}]   ;;  %s2788_s14 = inlined_call_operand.vmem [shape: f32[2,1,64], index: 14, kind: input, shape index: {}]   ;;  %s2789_s15 = inlined_call_operand.vmem [shape: bf16[2,64,32], index: 15, kind: input, shape index: {}]   ;;  %s2790_s16 = inlined_call_operand.vmem [shape: f32[2,1,32], index: 16, kind: input, shape index: {}]   ;;  %s2791_s17 = inlined_call_operand.vmem [shape: f32[2,1,32], index: 17, kind: input, shape index: {}]   ;;  %s2792_s18 = inlined_call_operand.vmem [shape: f32[2,1,32], index: 18, kind: input, shape index: {}]   ;;  %s2793_s19 = inlined_call_operand.hbm [shape: f32[2,2], index: 19, kind: output, shape index: {}]  }
   0x1   :  { %2799 = sst [smem:[#allocation7_spill]] %s2774_s0 }
   0x2   :  { %2800 = sst [smem:[#allocation8_spill]] %s2775_s1 }
   0x3   :  { %2801 = sst [smem:[#allocation9_spill]] %s2776_s2 }
   0x4   :  { %2802 = sst [smem:[#allocation10_spill]] %s2777_s3 }
   0x5   :  { %2803 = sst [smem:[#allocation11_spill]] %s2778_s4 }
   0x6   :  { %2804 = sst [smem:[#allocation12_spill]] %s2779_s5 }
   0x7   :  { %2805 = sst [smem:[#allocation13_spill]] %s2780_s6 }
   0x8   :  { %2806 = sst [smem:[#allocation14_spill]] %s2781_s7 }
   0x9   :  { %2807 = sst [smem:[#allocation15_spill]] %s2783_s9 }
   0xa   :  { %2808 = sst [smem:[#allocation16_spill]] %s2793_s19 }
   0xb   :  { %24 = vsyncpa [#allocation4], 0  ;;  %s2419_s0 = smov 0  }
   0xc LB: > { %2809 = sst [smem:[#allocation6_spill]] %s2298_s0  ;;  %s2425_s30 = sadd.s32 4294967295, %s2298_s0   ;;  %s2298_s0 = sphi %s2419_s0, %s30_s0  }
   0xd   : > { %p2052_p0 = scmp.ge.s32.totalorder %s2298_s0, 1  ;;  %p627_p1 = scmp.lt.s32.totalorder %s2298_s0, 3 }
   0xf   : > { %p628_p2 = pnand %p2052_p0, %p627_p1 }
  0x10   : > { %p717_p3 = scmp.lt.s32.totalorder (!%p628_p2), %s2425_s30, 1  ;;  %s2810_s7 = sld [smem:[#allocation14_spill]] (!%p628_p2) }
  0x11   : > { %631 = sbr.rel (%p628_p2) target bundleno = 2642 (0xa52), region = 96  ;;  %s2811_s9 = sld [smem:[#allocation15_spill]] (!%p628_p2) }
  0x12   : > { %p2061_p4 = scmp.ne.s32.totalorder (!%p628_p2), %s2425_s30, 0 }
  0x16   : > { %s2431_s20 = scalar_select %p717_p3, %s2425_s30, 1 }
  0x17   : > { %s2812_s28 = sld [smem:[#allocation7_spill]] (!%p2061_p4) }
  0x18   : > { %s2128_s21 = sshll.u32 %s2431_s20, 4  ;;  %s2131_s4 = sshll.u32 %s2431_s20, 5 }
  0x19   : > { %s2441_s25 = scalar_lea.vmem %s2810_s7, %s2128_s21  ;;  %s2446_s27 = scalar_lea.vmem %s2811_s9, %s2128_s21 }
  0x1a   : > { %s2463_s7 = scalar_lea.vmem %s2787_s13, %s2128_s21  ;;  %s746_s9 = scalar_lea.vmem %s2788_s14, %s2431_s20 }
  0x1b   : > { %s2473_s0 = scalar_lea.vmem %s2789_s15, %s2131_s4  ;;  %s754_s1 = scalar_lea.vmem %s2790_s16, %s2431_s20 }
  0x1c   : > { %s757_s23 = scalar_lea.vmem %s2791_s17, %s2431_s20  ;;  %s760_s5 = scalar_lea.vmem %s2792_s18, %s2431_s20 }
  0x1d   : > { %765 = sbr.rel (%p2061_p4) target bundleno = 312 (0x138), region = 100  ;;  %s2813_s19 = sld [smem:[#allocation9_spill]] (!%p2061_p4) }
  0x1e   : > { %s2814_s24 = sld [smem:[#allocation10_spill]] (!%p2061_p4) }
  0x22   : > { %v766_v0 = vld [vmem:[%s2812_s28] sm:$0xff]  ;;  %vm770_vm0 = vcmask 261120   ;;  %v767_v2 = vld [vmem:[%s2812_s28 + $0x8] sm:$0xff]  ;;  %v2300_v4 = vmov 32.0  }
  0x23   : > { %v771_v1 = vsel %vm770_vm0, %v766_v0, 0.0  ;;  %v774_v3 = vsel %vm770_vm0, %v767_v2, 0.0  ;;  %2177 = vrcp.f32 %v2300_v4  ;;  %v2175_v35 = vld [vmem:[%s2813_s19] ss:$0 sm:$0xff] }
  0x24   : > { %772 = vadd.xlane.f32.xlu0 %v771_v1  ;;  %v2176_v38 = vld [vmem:[%s2814_s24] ss:$0 sm:$0xff] }
  0x29   : > { %v2178_v5 = vpop.eup %2177 }
  0x2a   : > { %v778_v6 = vmul.f32 32.0, %v2178_v5  ;;  %vm782_vm1 = vweird.f32 %v2178_v5 }
  0x2c   : > { %775 = vadd.xlane.f32.xlu0 %v774_v3  ;;  %v779_v7 = vsub.f32 1.0, %v778_v6 }
  0x2e   : > { %v780_v8 = vmul.f32 %v2178_v5, %v779_v7 }
  0x30   : > { %v781_v9 = vadd.f32 %v2178_v5, %v780_v8 }
  0x32   : > { %v783_v10 = vsel %vm782_vm1, %v2178_v5, %v781_v9 }
  0x97   : > { %v773_v11 = vpop.xlane.xlu0 %772 }
  0x98   : > { %v784_v12 = vmul.f32 %v783_v10, %v773_v11 }
  0x9a   : > { %v786_v13 = vsub.f32 %v766_v0, %v784_v12 }
  0x9c   : > { %v788_v14 = vmul.f32 %v786_v13, %v786_v13 }
  0x9e   : > { %v790_v15 = vsel %vm770_vm0, %v788_v14, 0.0 }
  0x9f   : > { %791 = vadd.xlane.f32.xlu1 %v790_v15  ;;  %v776_v16 = vpop.xlane.xlu0 %775 }
  0xa0   : > { %v785_v17 = vmul.f32 %v783_v10, %v776_v16 }
  0xa2   : > { %v787_v18 = vsub.f32 %v767_v2, %v785_v17 }
  0xa4   : > { %v789_v19 = vmul.f32 %v787_v18, %v787_v18 }
  0xa6   : > { %v793_v20 = vsel %vm770_vm0, %v789_v19, 0.0 }
  0xa7   : > { %794 = vadd.xlane.f32.xlu1 %v793_v20 }
 0x112   : > { %v792_v21 = vpop.xlane.xlu1 %791 }
 0x113   : > { %v796_v22 = vmul.f32 %v792_v21, %v783_v10 }
 0x115   : > { %v798_v23 = vadd.f32 1e-05, %v796_v22 }
 0x117   : > { %2179 = vrsqrt.f32 %v798_v23  ;;  %vm806_vm3 = vweird.f32 %v798_v23 }
 0x11a   : > { %v795_v24 = vpop.xlane.xlu1 %794 }
 0x11b   : > { %v797_v25 = vmul.f32 %v795_v24, %v783_v10 }
 0x11d   : > { %v2180_v26 = vpop.eup %2179  ;;  %v799_v27 = vadd.f32 1e-05, %v797_v25 }
 0x11e   : > { %v801_v28 = vmul.f32 %v2180_v26, %v798_v23  ;;  %vm807_vm2 = vweird.f32 %v2180_v26 }
 0x11f   : > { %2181 = vrsqrt.f32 %v799_v27  ;;  %vm808_vm4 = vmor %vm806_vm3, %vm807_vm2  ;;  %vm816_vm6 = vweird.f32 %v799_v27 }
 0x120   : > { %v802_v29 = vmul.f32 %v2180_v26, %v801_v28 }
 0x122   : > { %v803_v30 = vmul.f32 0.5, %v802_v29 }
 0x124   : > { %v804_v31 = vsub.f32 1.5, %v803_v30 }
 0x125   : > { %v2182_v32 = vpop.eup %2181 }
 0x126   : > { %v805_v33 = vmul.f32 %v2180_v26, %v804_v31  ;;  %v811_v34 = vmul.f32 %v2182_v32, %v799_v27  ;;  %vm817_vm5 = vweird.f32 %v2182_v32 }
 0x127   : > { %vm818_vm7 = vmor %vm816_vm6, %vm817_vm5 }
 0x128   : > { %v809_v36 = vsel %vm808_vm4, %v2180_v26, %v805_v33  ;;  %v812_v37 = vmul.f32 %v2182_v32, %v811_v34 }
 0x129   : > { %v820_v39 = vmul.f32 %v809_v36, %v786_v13 }
 0x12a   : > { %v813_v40 = vmul.f32 0.5, %v812_v37 }
 0x12b   : > { %v825_v41 = vmul.f32 %v2175_v35, %v820_v39 }
 0x12c   : > { %v814_v42 = vsub.f32 1.5, %v813_v40 }
 0x12d   : > { %v830_v43 = vadd.f32 %v2176_v38, %v825_v41 }
 0x12e   : > { %v815_v44 = vmul.f32 %v2182_v32, %v814_v42 }
 0x12f   : > { %832 = vst.msk [vmem:[#allocation2] sm:$0xff] %vm770_vm0, %v830_v43 }
 0x130   : > { %v819_v45 = vsel %vm818_vm7, %v2182_v32, %v815_v44 }
 0x131   : > { %v821_v46 = vmul.f32 %v819_v45, %v787_v18 }
 0x133   : > { %v826_v47 = vmul.f32 %v2175_v35, %v821_v46 }
 0x135   : > { %v831_v48 = vadd.f32 %v2176_v38, %v826_v47 }
 0x137   : > { %833 = vst.msk [vmem:[#allocation2 + $0x8] sm:$0xff] %vm770_vm0, %v831_v48 }
 0x138 PF: > { %v2133_v49 = vld [vmem:[%s2441_s25 + $0x8] sm:$0xff]  ;;  %v2132_v50 = vld [vmem:[%s2441_s25] sm:$0xff]  ;;  %vm857_vm8 = vcmask 261120   ;;  %s2815_s4 = scalar_lea.vmem %s2782_s8, %s2431_s20  ;;  %s2301_s25 = smov 120   ;;  %vm890_vm9 = vcmask 64512   ;;  %vm993_vm10 = vcmask 1043456  }
 0x139   : > { %v2508_v51 = vld [vmem:[#allocation2] sm:$0xff]  ;;  %867 = vmatpush.bf16.msra.mxu0 %v2133_v49  ;;  %s2302_s29 = smov 88   ;;  %s2303_s2 = smov 96  }
 0x13a   : > { %v2198_v54 = vld [vmem:[%s2815_s4] ss:$0 sm:$0xff]  ;;  %s2304_s6 = smov 112   ;;  %s2305_s19 = smov 80  }
 0x13b   : > { %s2306_s22 = smov 72   ;;  %s2307_s21 = smov 104  }
 0x13c   : > { %s2816_s26 = sld [smem:[#allocation8_spill]]  ;;  %s2314_s24 = smov 24  }
 0x13d   : > { %868 = vmatpush.bf16.msra.mxu0 %v2132_v50  ;;  %s2817_s4 = scalar_lea.vmem %s2784_s10, %s2431_s20  ;;  %p2122_p5 = scmp.ne.s32.totalorder %s2425_s30, 1 }
 0x13e   : > { %v2510_v52 = vld [vmem:[#allocation2 + $0x8] sm:$0xff] }
 0x13f   : > { %v836_v53 = vpack.c.bf16 %v2510_v52, %v2508_v51 }
 0x141   : > { %2070 = vmatmul.msk.bf16.vlgmr.msra.gmra.mxu0 %vm857_vm8, %v836_v53 }
 0x142   : > { %v2199_v23 = vld [vmem:[%s2816_s26] ss:$0 sm:$0xff]  ;;  %v2200_v34 = vld [vmem:[%s2816_s26 + $0x1] ss:$0 sm:$0xff] }
 0x1be   : > { %v870_v55 = vpop.f32.mrf.mxu0 }
 0x1bf   : > { %v871_v56 = vadd.f32 %v2198_v54, %v870_v55 }
 0x1c1   : > { %v883_v57 = vpack.c.bf16 %v871_v56, %v871_v56 }
 0x1c3   : > { %v886_v58 = vunpack.c.l.b16 %v883_v57 }
 0x1c5   : > { %v2520_v59 = vpack.c.b16 %v886_v58, %v886_v58 }
 0x1c6   : > { %v872_v60 = vpop.f32.mrf.mxu0 }
 0x1c7   : > { %v873_v61 = vadd.f32 %v2198_v54, %v872_v60  ;;  %1031 = vrot.lane.b32.xlu2 %v2520_v59, %s2301_s25  ;;  %1033 = vrot.lane.b32.xlu1 %v2520_v59, %s2302_s29 }
 0x1c8   : > { %888 = vrot.lane.b32.xlu0 %v2520_v59, %s2303_s2 }
 0x1c9   : > { %v884_v62 = vpack.c.bf16 %v873_v61, %v873_v61 }
 0x1cb   : > { %v911_v63 = vunpack.c.l.b16 %v884_v62 }
 0x1cd   : > { %v2525_v0 = vpack.c.b16 %v911_v63, %v911_v63 }
 0x1cf   : > { %1054 = vrot.lane.b32.xlu2 %v2525_v0, %s2301_s25  ;;  %1056 = vrot.lane.b32.xlu1 %v2525_v0, %s2302_s29  ;;  %s2308_s29 = smov 56  }
 0x1d0   : > { %913 = vrot.lane.b32.xlu0 %v2525_v0, %s2303_s2  ;;  %s2309_s2 = smov 64  }
 0x1d7   : > { %1173 = vrot.lane.b32.xlu2 %v2520_v59, %s2304_s6  ;;  %1198 = vrot.lane.b32.xlu1 %v2525_v0, %s2305_s19 }
 0x1d8   : > { %1175 = vrot.lane.b32.xlu0 %v2520_v59, %s2305_s19  ;;  %s2311_s19 = smov 48  }
 0x1df   : > { %1340 = vrot.lane.b32.xlu2 %v2525_v0, %s2306_s22  ;;  %1317 = vrot.lane.b32.xlu1 %v2520_v59, %s2306_s22  ;;  %s2312_s22 = smov 8  }
 0x1e0   : > { %1196 = vrot.lane.b32.xlu0 %v2525_v0, %s2304_s6  ;;  %s2310_s6 = smov 40  }
 0x1e7   : > { %1338 = vrot.lane.b32.xlu1 %v2525_v0, %s2307_s21 }
 0x1e8   : > { %1315 = vrot.lane.b32.xlu0 %v2520_v59, %s2307_s21  ;;  %s2313_s21 = smov 16  }
 0x221   : > { %v1032_v1 = vpop.permute.xlu2 %1031 }
 0x229   : > { %v1055_v6 = vpop.permute.xlu2 %1054 }
 0x231   : > { %v1174_v11 = vpop.permute.xlu2 %1173 }
 0x239   : > { %v1034_v2 = vpop.permute.xlu1 %1033  ;;  %v1341_v16 = vpop.permute.xlu2 %1340 }
 0x23a   : > { %v889_v3 = vpop.permute.xlu0 %888  ;;  %v1039_v4 = vsel %vm890_vm9, %v1034_v2, 0  ;;  %v1346_v19 = vsel %vm890_vm9, %v1341_v16, 0 }
 0x23b   : > { %v895_v5 = vsel %vm890_vm9, %v889_v3, 0  ;;  %1048 = vmatpush.bf16.xpose.msrb.mxu0 %v1039_v4 }
 0x23c   : > { %904 = vmatpush.bf16.xpose.msra.mxu1 %v895_v5 }
 0x241   : > { %v1057_v7 = vpop.permute.xlu1 %1056 }
 0x242   : > { %v914_v8 = vpop.permute.xlu0 %913  ;;  %2075 = vmatmul.msk.bf16.vlgmr.msrb.gmra.mxu0 %vm890_vm9, %v1032_v1  ;;  %v1062_v9 = vsel %vm890_vm9, %v1057_v7, 0 }
 0x243   : > { %2071 = vmatmul.msk.bf16.vlgmr.msra.gmra.mxu1 %vm890_vm9, %v883_v57  ;;  %v919_v10 = vsel %vm890_vm9, %v914_v8, 0 }
 0x244   : > { %928 = vmatpush.bf16.xpose.msra.mxu2 %v919_v10  ;;  %1071 = vmatpush.bf16.xpose.msrb.mxu1 %v1062_v9 }
 0x249   : > { %v1199_v12 = vpop.permute.xlu1 %1198 }
 0x24a   : > { %v1204_v13 = vsel %vm890_vm9, %v1199_v12, 0  ;;  %v1176_v14 = vpop.permute.xlu0 %1175 }
 0x24b   : > { %v1181_v15 = vsel %vm890_vm9, %v1176_v14, 0  ;;  %2072 = vmatmul.msk.bf16.vlgmr.msra.gmra.mxu2 %vm890_vm9, %v884_v62 }
 0x24c   : > { %1213 = vmatpush.bf16.xpose.msra.mxu1 %v1204_v13  ;;  %1190 = vmatpush.bf16.xpose.msra.mxu0 %v1181_v15 }
 0x251   : > { %v1318_v17 = vpop.permute.xlu1 %1317 }
 0x252   : > { %v1323_v18 = vsel %vm890_vm9, %v1318_v17, 0  ;;  %v1197_v20 = vpop.permute.xlu0 %1196 }
 0x253   : > { %2076 = vmatmul.msk.bf16.vlgmr.msrb.gmra.mxu1 %vm890_vm9, %v1055_v6  ;;  %2079 = vmatmul.msk.bf16.vlgmr.msra.gmra.mxu0 %vm890_vm9, %v1174_v11 }
 0x254   : > { %1355 = vmatpush.bf16.xpose.msrb.mxu1 %v1346_v19  ;;  %1332 = vmatpush.bf16.xpose.msrb.mxu0 %v1323_v18 }
 0x259   : > { %v1339_v22 = vpop.permute.xlu1 %1338 }
 0x25a   : > { %v1316_v21 = vpop.permute.xlu0 %1315 }
 0x263   : > { %2080 = vmatmul.msk.bf16.vlgmr.msra.gmra.mxu1 %vm890_vm9, %v1197_v20  ;;  %2083 = vmatmul.msk.bf16.vlgmr.msrb.gmra.mxu0 %vm890_vm9, %v1316_v21 }
 0x273   : > { %2084 = vmatmul.msk.bf16.vlgmr.msrb.gmra.mxu1 %vm890_vm9, %v1339_v22 }
 0x2bf   : > { %v1050_v24 = vpop.f32.mrf.mxu0 }
 0x2c0   : > { %v906_v25 = vpop.f32.mrf.mxu1  ;;  %v1077_v26 = vmul.f32 0.35355338, %v1050_v24 }
 0x2c1   : > { %v934_v27 = vmul.f32 0.35355338, %v906_v25 }
 0x2c2   : > { %v1079_v28 = vadd.f32 %v2199_v23, %v1077_v26 }
 0x2c3   : > { %v936_v29 = vadd.f32 %v2199_v23, %v934_v27 }
 0x2c4   : > { %v1081_v30 = vsel %vm890_vm9, %v1079_v28, -inf }
 0x2c5   : > { %1082 = vmax.xlane.f32.xlu1 %v1081_v30  ;;  %v938_v31 = vsel %vm890_vm9, %v936_v29, -inf }
 0x2c6   : > { %939 = vmax.xlane.f32.xlu2 %v938_v31 }
 0x2c7   : > { %v1052_v32 = vpop.f32.mrf.mxu0 }
 0x2c8   : > { %v908_v33 = vpop.f32.mrf.mxu1 }
 0x2ce   : > { %v930_v35 = vpop.f32.mrf.mxu2 }
 0x2cf   : > { %v935_v36 = vmul.f32 0.35355338, %v930_v35 }
 0x2d0   : > { %v1073_v37 = vpop.f32.mrf.mxu1  ;;  %v1192_v38 = vpop.f32.mrf.mxu0 }
 0x2d1   : > { %v1078_v39 = vmul.f32 0.35355338, %v1073_v37  ;;  %v1219_v40 = vmul.f32 0.35355338, %v1192_v38  ;;  %v937_v41 = vadd.f32 %v2200_v34, %v935_v36 }
 0x2d3   : > { %v941_v42 = vsel %vm890_vm9, %v937_v41, -inf  ;;  %v1080_v43 = vadd.f32 %v2200_v34, %v1078_v39  ;;  %v2563_v44 = vadd.f32 %v2199_v23, %v1219_v40 }
 0x2d4   : > { %942 = vmax.xlane.f32.xlu0 %v941_v42 }
 0x2d5   : > { %v1084_v45 = vsel %vm890_vm9, %v1080_v43, -inf  ;;  %v1223_v2 = vsel %vm890_vm9, %v2563_v44, -inf }
 0x2d6   : > { %1085 = vmax.xlane.f32.xlu2 %v1084_v45  ;;  %v932_v46 = vpop.f32.mrf.mxu2 }
 0x2d8   : > { %v1075_v47 = vpop.f32.mrf.mxu1  ;;  %v1194_v48 = vpop.f32.mrf.mxu0 }
 0x2de   : > { %1152 = vrot.lane.b32.xlu1 %v2525_v0, %s2308_s29 }
 0x2e0   : > { %v1215_v49 = vpop.f32.mrf.mxu1  ;;  %v1334_v50 = vpop.f32.mrf.mxu0 }
 0x2e1   : > { %v1220_v53 = vmul.f32 0.35355338, %v1215_v49  ;;  %v1361_v1 = vmul.f32 0.35355338, %v1334_v50 }
 0x2e3   : > { %v2567_v54 = vadd.f32 %v2200_v34, %v1220_v53  ;;  %v1363_v3 = vadd.f32 %v2199_v23, %v1361_v1 }
 0x2e5   : > { %v1226_v55 = vsel %vm890_vm9, %v2567_v54, -inf  ;;  %v1365_v4 = vsel %vm890_vm9, %v1363_v3, -inf }
 0x2e6   : > { %1227 = vmax.xlane.f32.xlu0 %v1226_v55 }
 0x2e8   : > { %v1217_v56 = vpop.f32.mrf.mxu1  ;;  %v1336_v57 = vpop.f32.mrf.mxu0 }
 0x2ee   : > { %988 = vrot.lane.b32.xlu2 %v2520_v59, %s2309_s2 }
 0x2f0   : > { %v1357_v58 = vpop.f32.mrf.mxu1 }
 0x2f1   : > { %v1362_v60 = vmul.f32 0.35355338, %v1357_v58 }
 0x2f3   : > { %v1364_v61 = vadd.f32 %v2200_v34, %v1362_v60 }
 0x2f5   : > { %v1368_v62 = vsel %vm890_vm9, %v1364_v61, -inf }
 0x2f6   : > { %1369 = vmax.xlane.f32.xlu0 %v1368_v62 }
 0x2f8   : > { %v1359_v63 = vpop.f32.mrf.mxu1 }
 0x30a   : > { %1010 = vrot.lane.b32.xlu0 %v2525_v0, %s2309_s2  ;;  %s2821_s2 = sld [smem:[#allocation12_spill]] (!%p2122_p5) }
 0x317   : > { %1224 = vmax.xlane.f32.xlu2 %v1223_v2 }
 0x31f   : > { %1366 = vmax.xlane.f32.xlu2 %v1365_v4 }
 0x337   : > { %1131 = vrot.lane.b32.xlu2 %v2520_v59, %s2308_s29  ;;  %s2818_s29 = scalar_lea.vmem %s2785_s11, %s2431_s20 }
 0x338   : > { %v1083_v5 = vpop.xlane.xlu1 %1082 }
 0x339   : > { %v1087_v6 = vsub.f32 %v1079_v28, %v1083_v5  ;;  %v940_v7 = vpop.xlane.xlu2 %939 }
 0x33a   : > { %v944_v8 = vsub.f32 %v936_v29, %v940_v7 }
 0x33b   : > { %v1089_v9 = vmul.f32 1.442695, %v1087_v6 }
 0x33c   : > { %v946_v10 = vmul.f32 1.442695, %v944_v8 }
 0x33d   : > { %2208 = vpow2.f32 %v1089_v9 }
 0x33e   : > { %2210 = vpow2.f32 %v946_v10 }
 0x343   : > { %v2578_v11 = vpop.eup %2208 }
 0x344   : > { %v2580_v12 = vpop.eup %2210  ;;  %v1093_v13 = vsel %vm890_vm9, %v2578_v11, 0.0 }
 0x345   : > { %v950_v14 = vsel %vm890_vm9, %v2580_v12, 0.0  ;;  %1094 = vadd.xlane.f32.xlu0 %v1093_v13 }
 0x346   : > { %951 = vadd.xlane.f32.xlu1 %v950_v14 }
 0x347   : > { %v943_v15 = vpop.xlane.xlu0 %942 }
 0x348   : > { %v945_v16 = vsub.f32 %v937_v41, %v943_v15 }
 0x349   : > { %v1086_v17 = vpop.xlane.xlu2 %1085 }
 0x34a   : > { %v948_v18 = vmul.f32 1.442695, %v945_v16  ;;  %v1088_v19 = vsub.f32 %v1080_v43, %v1086_v17 }
 0x34c   : > { %2212 = vpow2.f32 %v948_v18  ;;  %v1091_v20 = vmul.f32 1.442695, %v1088_v19 }
 0x34e   : > { %2214 = vpow2.f32 %v1091_v20 }
 0x350   : > { %v1153_v53 = vpop.permute.xlu1 %1152 }
 0x351   : > { %v989_v21 = vpop.permute.xlu2 %988 }
 0x352   : > { %v2586_v22 = vpop.eup %2212  ;;  %v995_v23 = vsel %vm993_vm10, %v989_v21, 0  ;;  %v1158_v21 = vsel %vm993_vm10, %v1153_v53, 0 }
 0x353   : > { %1004 = vmatpush.bf16.msra.mxu3 %v995_v23  ;;  %v953_v24 = vsel %vm890_vm9, %v2586_v22, 0.0 }
 0x354   : > { %954 = vadd.xlane.f32.xlu1 %v953_v24  ;;  %v2591_v25 = vpop.eup %2214 }
 0x355   : > { %v1096_v26 = vsel %vm890_vm9, %v2591_v25, 0.0 }
 0x359   : > { %v1228_v27 = vpop.xlane.xlu0 %1227 }
 0x35a   : > { %v1230_v37 = vsub.f32 %v2567_v54, %v1228_v27 }
 0x35c   : > { %1097 = vadd.xlane.f32.xlu1 %v1096_v26  ;;  %v1233_v39 = vmul.f32 1.442695, %v1230_v37 }
 0x369   : > { %v1370_v28 = vpop.xlane.xlu0 %1369 }
 0x36a   : > { %v1372_v29 = vsub.f32 %v1364_v61, %v1370_v28 }
 0x36c   : > { %v1375_v30 = vmul.f32 1.442695, %v1372_v29 }
 0x36e   : > { %2216 = vpow2.f32 %v1375_v30 }
 0x374   : > { %v2595_v31 = vpop.eup %2216 }
 0x375   : > { %v1380_v32 = vsel %vm890_vm9, %v2595_v31, 0.0 }
 0x376   : > { %1381 = vadd.xlane.f32.xlu2 %v1380_v32 }
 0x37c   : > { %v1011_v33 = vpop.permute.xlu0 %1010 }
 0x37d   : > { %v1016_v34 = vsel %vm993_vm10, %v1011_v33, 0 }
 0x37e   : > { %1025 = vmatpush.bf16.msrb.mxu3 %v1016_v34 }
 0x38a   : > { %v1225_v35 = vpop.xlane.xlu2 %1224 }
 0x38b   : > { %v1229_v36 = vsub.f32 %v2563_v44, %v1225_v35 }
 0x38d   : > { %v1231_v38 = vmul.f32 1.442695, %v1229_v36 }
 0x38f   : > { %2218 = vpow2.f32 %v1231_v38 }
 0x390   : > { %2220 = vpow2.f32 %v1233_v39 }
 0x392   : > { %v1367_v40 = vpop.xlane.xlu2 %1366 }
 0x393   : > { %v1371_v41 = vsub.f32 %v1363_v3, %v1367_v40 }
 0x395   : > { %v2602_v42 = vpop.eup %2218  ;;  %v1373_v43 = vmul.f32 1.442695, %v1371_v41 }
 0x396   : > { %v1235_v45 = vsel %vm890_vm9, %v2602_v42, 0.0  ;;  %v2606_v47 = vpop.eup %2220 }
 0x397   : > { %2222 = vpow2.f32 %v1373_v43  ;;  %1236 = vadd.xlane.f32.xlu1 %v1235_v45  ;;  %v1238_v50 = vsel %vm890_vm9, %v2606_v47, 0.0 }
 0x39a   : > { %v1132_v46 = vpop.permute.xlu2 %1131 }
 0x39b   : > { %v1137_v44 = vsel %vm993_vm10, %v1132_v46, 0 }
 0x39c   : > { %1146 = vmatpush.bf16.msrb.mxu2 %v1137_v44 }
 0x39d   : > { %v2609_v48 = vpop.eup %2222 }
 0x39e   : > { %v1377_v49 = vsel %vm890_vm9, %v2609_v48, 0.0 }
 0x39f   : > { %1378 = vadd.xlane.f32.xlu0 %v1377_v49  ;;  %1239 = vadd.xlane.f32.xlu1 %v1238_v50 }
 0x3b3   : > { %1436 = vrot.lane.b32.xlu0 %v2525_v0, %s2310_s6 }
 0x3b8   : > { %1273 = vrot.lane.b32.xlu1 %v2520_v59, %s2311_s19  ;;  %v1095_v54 = vpop.xlane.xlu0 %1094 }
 0x3b9   : > { %v952_v55 = vpop.xlane.xlu1 %951  ;;  %2224 = vrcp.f32 %v1095_v54  ;;  %v1110_v2 = vand.u32 2147483648, %v1095_v54  ;;  %v1108_v4 = vand.u32 2147483647, %v1095_v54  ;;  %vm1104_vm13 = vweird.f32 %v1095_v54 }
 0x3ba   : > { %2226 = vrcp.f32 %v952_v55  ;;  %v967_v63 = vand.u32 2147483648, %v952_v55  ;;  %v965_v5 = vand.u32 2147483647, %v952_v55  ;;  %vm961_vm14 = vweird.f32 %v952_v55 }
 0x3bb   : > { %vm1109_vm1 = vcmp.eq.f32.partialorder %v1108_v4, 8.507059e+37 }
 0x3bc   : > { %v968_v9 = vor.u32 1.1754944e-38, %v967_v63  ;;  %vm966_vm2 = vcmp.eq.f32.partialorder %v965_v5, 8.507059e+37 }
 0x3bf   : > { %v2225_v56 = vpop.eup %2224 }
 0x3c0   : > { %v2227_v57 = vpop.eup %2226  ;;  %v1100_v58 = vmul.f32 %v2225_v56, %v1095_v54  ;;  %1294 = vrot.lane.b32.xlu1 %v2525_v0, %s2311_s19  ;;  %vm1105_vm11 = vweird.f32 %v2225_v56  ;;  %v1111_v0 = vor.u32 1.1754944e-38, %v1110_v2  ;;  %s2819_s19 = scalar_lea.vmem %s2786_s12, %s2431_s20 }
 0x3c1   : > { %v957_v60 = vmul.f32 %v2227_v57, %v952_v55  ;;  %vm962_vm12 = vweird.f32 %v2227_v57  ;;  %vm1106_vm15 = vmor %vm1104_vm13, %vm1105_vm11 }
 0x3c2   : > { %v1101_v61 = vsub.f32 1.0, %v1100_v58  ;;  %vm963_vm0 = vmor %vm961_vm14, %vm962_vm12 }
 0x3c3   : > { %v958_v62 = vsub.f32 1.0, %v957_v60 }
 0x3c4   : > { %v1102_v1 = vmul.f32 %v2225_v56, %v1101_v61 }
 0x3c5   : > { %v959_v3 = vmul.f32 %v2227_v57, %v958_v62 }
 0x3c6   : > { %v1103_v6 = vadd.f32 %v2225_v56, %v1102_v1 }
 0x3c7   : > { %v955_v7 = vpop.xlane.xlu1 %954  ;;  %v960_v8 = vadd.f32 %v2227_v57, %v959_v3 }
 0x3c8   : > { %2228 = vrcp.f32 %v955_v7  ;;  %1415 = vrot.lane.b32.xlu1 %v2520_v59, %s2310_s6  ;;  %v1107_v13 = vsel %vm1106_vm15, %v2225_v56, %v1103_v6  ;;  %v982_v26 = vand.u32 2147483648, %v955_v7  ;;  %vm976_vm4 = vweird.f32 %v955_v7 }
 0x3c9   : > { %v964_v10 = vsel %vm963_vm0, %v2227_v57, %v960_v8  ;;  %v1112_v15 = vsel %vm1109_vm1, %v1111_v0, %v1107_v13 }
 0x3ca   : > { %v969_v14 = vsel %vm966_vm2, %v968_v9, %v964_v10  ;;  %v1113_v17 = vmul.f32 %v2578_v11, %v1112_v15  ;;  %v983_v29 = vor.u32 1.1754944e-38, %v982_v26 }
 0x3cb   : > { %v970_v16 = vmul.f32 %v2580_v12, %v969_v14  ;;  %v980_v12 = vand.u32 2147483647, %v955_v7 }
 0x3cc   : > { %v1129_v19 = vpack.c.bf16 %v1113_v17, %v1113_v17 }
 0x3cd   : > { %v986_v18 = vpack.c.bf16 %v970_v16, %v970_v16  ;;  %vm981_vm6 = vcmp.eq.f32.partialorder %v980_v12, 8.507059e+37 }
 0x3ce   : > { %v2229_v20 = vpop.eup %2228  ;;  %2077 = vmatmul.msk.bf16.vlgmr.msrb.gmra.mxu2 %vm890_vm9, %v1129_v19 }
 0x3cf   : > { %v972_v23 = vmul.f32 %v2229_v20, %v955_v7  ;;  %2073 = vmatmul.msk.bf16.vlgmr.msra.gmra.mxu3 %vm890_vm9, %v986_v18  ;;  %v1098_v24 = vpop.xlane.xlu1 %1097  ;;  %vm977_vm3 = vweird.f32 %v2229_v20 }
 0x3d0   : > { %2230 = vrcp.f32 %v1098_v24  ;;  %1167 = vmatpush.bf16.msra.mxu3 %v1158_v21  ;;  %vm978_vm5 = vmor %vm976_vm4, %vm977_vm3  ;;  %v1125_v39 = vand.u32 2147483648, %v1098_v24  ;;  %vm1119_vm11 = vweird.f32 %v1098_v24  ;;  %v1123_v40 = vand.u32 2147483647, %v1098_v24 }
 0x3d1   : > { %v973_v59 = vsub.f32 1.0, %v972_v23 }
 0x3d2   : > { %v1126_v43 = vor.u32 1.1754944e-38, %v1125_v39  ;;  %vm1124_vm13 = vcmp.eq.f32.partialorder %v1123_v40, 8.507059e+37 }
 0x3d3   : > { %v974_v27 = vmul.f32 %v2229_v20, %v973_v59 }
 0x3d5   : > { %v975_v28 = vadd.f32 %v2229_v20, %v974_v27 }
 0x3d6   : > { %v2231_v11 = vpop.eup %2230 }
 0x3d7   : > { %v1115_v30 = vmul.f32 %v2231_v11, %v1098_v24  ;;  %v979_v32 = vsel %vm978_vm5, %v2229_v20, %v975_v28  ;;  %vm1120_vm7 = vweird.f32 %v2231_v11 }
 0x3d8   : > { %v984_v33 = vsel %vm981_vm6, %v983_v29, %v979_v32  ;;  %vm1121_vm12 = vmor %vm1119_vm11, %vm1120_vm7 }
 0x3d9   : > { %v1116_v34 = vsub.f32 1.0, %v1115_v30  ;;  %v985_v35 = vmul.f32 %v2586_v22, %v984_v33 }
 0x3db   : > { %v1117_v36 = vmul.f32 %v2231_v11, %v1116_v34  ;;  %v987_v37 = vpack.c.bf16 %v985_v35, %v985_v35 }
 0x3dd   : > { %v1118_v38 = vadd.f32 %v2231_v11, %v1117_v36 }
 0x3df   : > { %2074 = vmatmul.msk.bf16.vlgmr.msrb.gmra.mxu3 %vm890_vm9, %v987_v37  ;;  %v1122_v41 = vsel %vm1121_vm12, %v2231_v11, %v1118_v38 }
 0x3e0   : > { %v1127_v45 = vsel %vm1124_vm13, %v1126_v43, %v1122_v41 }
 0x3e1   : > { %v1128_v46 = vmul.f32 %v2591_v25, %v1127_v45 }
 0x3e3   : > { %v1130_v44 = vpack.c.bf16 %v1128_v46, %v1128_v46 }
 0x3e9   : > { %v2630_v60 = vpop.xlane.xlu2 %1381 }
 0x3ea   : > { %v1407_v36 = vand.u32 2147483647, %v2630_v60 }
 0x3ef   : > { %2078 = vmatmul.msk.bf16.vlgmr.msra.gmra.mxu3 %vm890_vm9, %v1130_v44 }
 0x40a   : > { %v1237_v22 = vpop.xlane.xlu1 %1236 }
 0x40b   : > { %2232 = vrcp.f32 %v1237_v22  ;;  %v1252_v63 = vand.u32 2147483648, %v1237_v22  ;;  %vm1246_vm15 = vweird.f32 %v1237_v22  ;;  %v1250_v1 = vand.u32 2147483647, %v1237_v22 }
 0x40d   : > { %v1253_v5 = vor.u32 1.1754944e-38, %v1252_v63  ;;  %vm1251_vm1 = vcmp.eq.f32.partialorder %v1250_v1, 8.507059e+37 }
 0x411   : > { %v2233_v49 = vpop.eup %2232 }
 0x412   : > { %v1240_v50 = vpop.xlane.xlu1 %1239  ;;  %v1242_v53 = vmul.f32 %v2233_v49, %v1237_v22  ;;  %v1379_v55 = vpop.xlane.xlu0 %1378  ;;  %vm1247_vm14 = vweird.f32 %v2233_v49 }
 0x413   : > { %2234 = vrcp.f32 %v1240_v50  ;;  %vm1248_vm0 = vmor %vm1246_vm15, %vm1247_vm14  ;;  %v1267_v0 = vand.u32 2147483648, %v1240_v50  ;;  %vm1261_vm3 = vweird.f32 %v1240_v50  ;;  %v1265_v13 = vand.u32 2147483647, %v1240_v50 }
 0x414   : > { %v1243_v54 = vsub.f32 1.0, %v1242_v53  ;;  %2236 = vrcp.f32 %v1379_v55  ;;  %vm1388_vm7 = vweird.f32 %v1379_v55  ;;  %v1392_v26 = vand.u32 2147483647, %v1379_v55 }
 0x415   : > { %2238 = vrcp.f32 %v2630_v60  ;;  %v1268_v19 = vor.u32 1.1754944e-38, %v1267_v0  ;;  %vm1266_vm5 = vcmp.eq.f32.partialorder %v1265_v13, 8.507059e+37  ;;  %vm1403_vm14 = vweird.f32 %v2630_v60 }
 0x416   : > { %v1244_v57 = vmul.f32 %v2233_v49, %v1243_v54  ;;  %vm1393_vm12 = vcmp.eq.f32.partialorder %v1392_v26, 8.507059e+37 }
 0x418   : > { %v1245_v61 = vadd.f32 %v2233_v49, %v1244_v57 }
 0x419   : > { %v2235_v56 = vpop.eup %2234 }
 0x41a   : > { %v1257_v58 = vmul.f32 %v2235_v56, %v1240_v50  ;;  %v2237_v62 = vpop.eup %2236  ;;  %v1249_v2 = vsel %vm1248_vm0, %v2233_v49, %v1245_v61  ;;  %vm1262_vm2 = vweird.f32 %v2235_v56  ;;  %vm1408_vm0 = vcmp.eq.f32.partialorder %v1407_v36, 8.507059e+37 }
 0x41b   : > { %v1384_v4 = vmul.f32 %v2237_v62, %v1379_v55  ;;  %v1254_v6 = vsel %vm1251_vm1, %v1253_v5, %v1249_v2  ;;  %v2239_v9 = vpop.eup %2238  ;;  %vm1263_vm4 = vmor %vm1261_vm3, %vm1262_vm2  ;;  %vm1389_vm6 = vweird.f32 %v2237_v62  ;;  %v2134_v5 = vld [vmem:[%s2446_s27] sm:$0xff]  ;;  %vm1486_vm1 = vcmask 195584  }
 0x41c   : > { %v1258_v25 = vsub.f32 1.0, %v1257_v58  ;;  %v1255_v10 = vmul.f32 %v2602_v42, %v1254_v6  ;;  %v1399_v15 = vmul.f32 %v2239_v9, %v2630_v60  ;;  %v1394_v42 = vand.u32 2147483648, %v1379_v55  ;;  %vm1390_vm11 = vmor %vm1388_vm7, %vm1389_vm6 }
 0x41d   : > { %v1385_v8 = vsub.f32 1.0, %v1384_v4  ;;  %vm1404_vm13 = vweird.f32 %v2239_v9  ;;  %v2135_v4 = vld [vmem:[%s2446_s27 + $0x8] sm:$0xff]  ;;  %s2822_s27 = sld [smem:[#allocation13_spill]] (!%p2122_p5) }
 0x41e   : > { %v1259_v3 = vmul.f32 %v2235_v56, %v1258_v25  ;;  %v1271_v20 = vpack.c.bf16 %v1255_v10, %v1255_v10  ;;  %v1400_v23 = vsub.f32 1.0, %v1399_v15  ;;  %v1395_v30 = vor.u32 1.1754944e-38, %v1394_v42  ;;  %vm1405_vm15 = vmor %vm1403_vm14, %vm1404_vm13  ;;  %1519 = vmatpush.bf16.msra.mxu0 %v2135_v4  ;;  %v2202_v4 = vld [vmem:[%s2818_s29] ss:$0 sm:$0xff] }
 0x41f   : > { %v1386_v17 = vmul.f32 %v2237_v62, %v1385_v8 }
 0x420   : > { %v1260_v7 = vadd.f32 %v2235_v56, %v1259_v3  ;;  %v1401_v28 = vmul.f32 %v2239_v9, %v1400_v23 }
 0x421   : > { %v1387_v24 = vadd.f32 %v2237_v62, %v1386_v17 }
 0x422   : > { %v1264_v16 = vsel %vm1263_vm4, %v2235_v56, %v1260_v7  ;;  %v1402_v35 = vadd.f32 %v2239_v9, %v1401_v28  ;;  %1520 = vmatpush.bf16.msra.mxu0 %v2134_v5 }
 0x423   : > { %v1269_v21 = vsel %vm1266_vm5, %v1268_v19, %v1264_v16  ;;  %v1391_v11 = vsel %vm1390_vm11, %v2237_v62, %v1387_v24  ;;  %v2201_v24 = vld [vmem:[%s2817_s4] ss:$0 sm:$0xff] }
 0x424   : > { %v1270_v59 = vmul.f32 %v2606_v47, %v1269_v21  ;;  %v1396_v34 = vsel %vm1393_vm12, %v1395_v30, %v1391_v11  ;;  %v1409_v47 = vand.u32 2147483648, %v2630_v60  ;;  %v1406_v39 = vsel %vm1405_vm15, %v2239_v9, %v1402_v35 }
 0x425   : > { %v1437_v27 = vpop.permute.xlu0 %1436  ;;  %v1397_v37 = vmul.f32 %v2609_v48, %v1396_v34  ;;  %v2315_v30 = vmov 32.0  }
 0x426   : > { %v1442_v32 = vsel %vm993_vm10, %v1437_v27, 0  ;;  %v1272_v33 = vpack.c.bf16 %v1270_v59, %v1270_v59  ;;  %v1410_v41 = vor.u32 1.1754944e-38, %v1409_v47  ;;  %2240 = vrcp.f32 %v2315_v30 }
 0x427   : > { %v1413_v43 = vpack.c.bf16 %v1397_v37, %v1397_v37 }
 0x428   : > { %v1411_v45 = vsel %vm1408_vm0, %v1410_v41, %v1406_v39 }
 0x429   : > { %v1412_v46 = vmul.f32 %v2595_v31, %v1411_v45 }
 0x42a   : > { %v1274_v14 = vpop.permute.xlu1 %1273 }
 0x42b   : > { %v1279_v18 = vsel %vm993_vm10, %v1274_v14, 0  ;;  %v1414_v44 = vpack.c.bf16 %v1412_v46, %v1412_v46 }
 0x42c   : > { %1288 = vmatpush.bf16.msra.mxu2 %v1279_v18 }
 0x42f   : > { %2081 = vmatmul.msk.bf16.vlgmr.msra.gmra.mxu2 %vm890_vm9, %v1271_v20 }
 0x432   : > { %v1295_v12 = vpop.permute.xlu1 %1294 }
 0x433   : > { %v1300_v29 = vsel %vm993_vm10, %v1295_v12, 0 }
 0x434   : > { %1309 = vmatpush.bf16.msrb.mxu3 %v1300_v29 }
 0x437   : > { %2082 = vmatmul.msk.bf16.vlgmr.msrb.gmra.mxu3 %vm890_vm9, %v1272_v33 }
 0x438   : > { %1451 = vmatpush.bf16.msra.mxu3 %v1442_v32  ;;  %v2241_v32 = vpop.eup %2240 }
 0x439   : > { %v1538_v33 = vmul.f32 32.0, %v2241_v32 }
 0x43a   : > { %v1416_v38 = vpop.permute.xlu1 %1415 }
 0x43b   : > { %v1421_v40 = vsel %vm993_vm10, %v1416_v38, 0  ;;  %vm1483_vm10 = vcmask 130048   ;;  %v1539_v34 = vsub.f32 1.0, %v1538_v33 }
 0x43c   : > { %1430 = vmatpush.bf16.msrb.mxu2 %v1421_v40 }
 0x43d   : > { %v1540_v35 = vmul.f32 %v2241_v32, %v1539_v34 }
 0x43f   : > { %2085 = vmatmul.msk.bf16.vlgmr.msrb.gmra.mxu2 %vm890_vm9, %v1413_v43  ;;  %v1541_v47 = vadd.f32 %v2241_v32, %v1540_v35  ;;  %v2140_v35 = vld [vmem:[%s2473_s0 + $0x10] sm:$0xff] }
 0x447   : > { %2086 = vmatmul.msk.bf16.vlgmr.msra.gmra.mxu3 %vm890_vm9, %v1414_v44 }
 0x451   : > { %v1148_v49 = vpop.f32.mrf.mxu2 }
 0x452   : > { %v1006_v22 = vpop.f32.mrf.mxu3 }
 0x459   : > { %v1150_v50 = vpop.f32.mrf.mxu2 }
 0x45a   : > { %v1008_v48 = vpop.f32.mrf.mxu3  ;;  %v2136_v50 = vld [vmem:[%s2463_s7] sm:$0xff] }
 0x462   : > { %v1027_v53 = vpop.f32.mrf.mxu3 }
 0x46a   : > { %v1029_v54 = vpop.f32.mrf.mxu3 }
 0x472   : > { %v1169_v55 = vpop.f32.mrf.mxu3 }
 0x473   : > { %v2183_v56 = vpack.i.bf16 %v1169_v55, %v1148_v49 }
 0x475   : > { %2184 = vrot.lane.b32.xlu2 %v2183_v56, %s2312_s22 }
 0x47a   : > { %v1171_v57 = vpop.f32.mrf.mxu3 }
 0x4b2   : > { %v1290_v58 = vpop.f32.mrf.mxu2 }
 0x4ba   : > { %v1292_v60 = vpop.f32.mrf.mxu2  ;;  %v1311_v61 = vpop.f32.mrf.mxu3 }
 0x4bb   : > { %v2188_v31 = vpack.i.bf16 %v1311_v61, %v1290_v58 }
 0x4bd   : > { %2189 = vrot.lane.b32.xlu1 %v2188_v31, %s2313_s21 }
 0x4c2   : > { %v1313_v25 = vpop.f32.mrf.mxu3  ;;  %v1432_v62 = vpop.f32.mrf.mxu2 }
 0x4ca   : > { %v1434_v63 = vpop.f32.mrf.mxu2  ;;  %v1453_v1 = vpop.f32.mrf.mxu3 }
 0x4cb   : > { %v2193_v2 = vpack.i.bf16 %v1453_v1, %v1432_v62 }
 0x4cd   : > { %2194 = vrot.lane.b32.xlu1 %v2193_v2, %s2314_s24 }
 0x4cf   : > { %v2185_v7 = vpop.permute.xlu2 %2184 }
 0x4d0   : > { %v2187_v8 = vunpack.i.h.bf16 %v2185_v7  ;;  %v2186_v9 = vunpack.i.l.bf16 %v2185_v7 }
 0x4d2   : > { %v1455_v3 = vpop.f32.mrf.mxu3  ;;  %v1482_v14 = vsel %vm890_vm9, %v1027_v53, %v2187_v8  ;;  %v1481_v15 = vsel %vm890_vm9, %v1006_v22, %v2186_v9  ;;  %vm1542_vm9 = vweird.f32 %v2241_v32  ;;  %v2137_v22 = vld [vmem:[%s2463_s7 + $0x8] sm:$0xff]  ;;  %v2203_v8 = vld [vmem:[%s2819_s19] ss:$0 sm:$0xff] }
 0x4d3   : > { %1622 = vmatpush.bf16.msra.mxu1 %v2137_v22 }
 0x4d7   : > { %1623 = vmatpush.bf16.msra.mxu1 %v2136_v50 }
 0x52f   : > { %v2190_v6 = vpop.permute.xlu1 %2189 }
 0x530   : > { %v2192_v0 = vunpack.i.h.bf16 %v2190_v6  ;;  %v2191_v10 = vunpack.i.l.bf16 %v2190_v6 }
 0x532   : > { %v1485_v18 = vsel %vm1483_vm10, %v1482_v14, %v2192_v0  ;;  %v1484_v19 = vsel %vm1483_vm10, %v1481_v15, %v2191_v10 }
 0x53f   : > { %v2195_v13 = vpop.permute.xlu1 %2194 }
 0x540   : > { %v2197_v16 = vunpack.i.h.bf16 %v2195_v13  ;;  %v2196_v17 = vunpack.i.l.bf16 %v2195_v13 }
 0x542   : > { %v1488_v20 = vsel %vm1486_vm1, %v1485_v18, %v2197_v16  ;;  %v1487_v21 = vsel %vm1486_vm1, %v1484_v19, %v2196_v17  ;;  %v2204_v16 = vld [vmem:[%s746_s9] ss:$0 sm:$0xff] }
 0x543   : > { %v1489_v23 = vpack.c.bf16 %v1488_v20, %v1487_v21 }
 0x545   : > { %2095 = vmatmul.msk.bf16.vlgmr.msra.gmra.mxu0 %vm857_vm8, %v1489_v23 }
 0x5c2   : > { %v1522_v42 = vpop.f32.mrf.mxu0 }
 0x5c3   : > { %v1523_v59 = vadd.f32 %v2201_v24, %v1522_v42 }
 0x5c5   : > { %v1527_v26 = vadd.f32 %v1523_v59, %v2508_v51  ;;  %v2663_v51 = vsel %vm1542_vm9, %v2241_v32, %v1541_v47 }
 0x5c7   : > { %v1531_v27 = vsel %vm857_vm8, %v1527_v26, 0.0 }
 0x5c8   : > { %1532 = vadd.xlane.f32.xlu1 %v1531_v27 }
 0x5ca   : > { %v1524_v12 = vpop.f32.mrf.mxu0 }
 0x5cb   : > { %v1525_v28 = vadd.f32 %v2201_v24, %v1524_v12 }
 0x5cd   : > { %v1528_v11 = vadd.f32 %v1525_v28, %v2510_v52 }
 0x5cf   : > { %v1534_v29 = vsel %vm857_vm8, %v1528_v11, 0.0 }
 0x5d0   : > { %1535 = vadd.xlane.f32.xlu0 %v1534_v29  ;;  %v2141_v29 = vld [vmem:[%s2473_s0 + $0x18] sm:$0xff] }
 0x5d1   : > { %1755 = vmatpush.bf16.msra.mxu2 %v2141_v29 }
 0x5d5   : > { %1756 = vmatpush.bf16.msra.mxu2 %v2140_v35 }
 0x63b   : > { %v1533_v36 = vpop.xlane.xlu1 %1532 }
 0x63c   : > { %v1544_v37 = vmul.f32 %v2663_v51, %v1533_v36 }
 0x63e   : > { %v1546_v38 = vsub.f32 %v1527_v26, %v1544_v37 }
 0x640   : > { %v1548_v52 = vmul.f32 %v1546_v38, %v1546_v38 }
 0x642   : > { %v1550_v39 = vsel %vm857_vm8, %v1548_v52, 0.0 }
 0x643   : > { %v1536_v40 = vpop.xlane.xlu0 %1535  ;;  %1551 = vadd.xlane.f32.xlu2 %v1550_v39 }
 0x644   : > { %v1545_v41 = vmul.f32 %v2663_v51, %v1536_v40  ;;  %v2139_v40 = vld [vmem:[%s2473_s0 + $0x8] sm:$0xff] }
 0x645   : > { %1757 = vmatpush.bf16.msra.mxu2 %v2139_v40 }
 0x646   : > { %v1547_v43 = vsub.f32 %v1528_v11, %v1545_v41 }
 0x648   : > { %v1549_v45 = vmul.f32 %v1547_v43, %v1547_v43 }
 0x64a   : > { %v1553_v46 = vsel %vm857_vm8, %v1549_v45, 0.0 }
 0x64b   : > { %1554 = vadd.xlane.f32.xlu1 %v1553_v46 }
 0x6b6   : > { %v1552_v44 = vpop.xlane.xlu2 %1551 }
 0x6b7   : > { %v1556_v49 = vmul.f32 %v1552_v44, %v2663_v51 }
 0x6b9   : > { %v1558_v48 = vadd.f32 1e-05, %v1556_v49 }
 0x6bb   : > { %2242 = vrsqrt.f32 %v1558_v48  ;;  %vm1566_vm3 = vweird.f32 %v1558_v48 }
 0x6be   : > { %v1555_v53 = vpop.xlane.xlu1 %1554 }
 0x6bf   : > { %v1557_v54 = vmul.f32 %v1555_v53, %v2663_v51 }
 0x6c1   : > { %v2243_v55 = vpop.eup %2242  ;;  %v1559_v56 = vadd.f32 1e-05, %v1557_v54 }
 0x6c2   : > { %v1561_v57 = vmul.f32 %v2243_v55, %v1558_v48  ;;  %vm1567_vm2 = vweird.f32 %v2243_v55  ;;  %v2138_v48 = vld [vmem:[%s2473_s0] sm:$0xff] }
 0x6c3   : > { %2244 = vrsqrt.f32 %v1559_v56  ;;  %vm1568_vm4 = vmor %vm1566_vm3, %vm1567_vm2  ;;  %vm1576_vm6 = vweird.f32 %v1559_v56  ;;  %1758 = vmatpush.bf16.msra.mxu2 %v2138_v48  ;;  %vm1747_vm3 = vcmask 523264  }
 0x6c4   : > { %v1562_v58 = vmul.f32 %v2243_v55, %v1561_v57 }
 0x6c6   : > { %v1563_v60 = vmul.f32 0.5, %v1562_v58 }
 0x6c8   : > { %v1564_v61 = vsub.f32 1.5, %v1563_v60 }
 0x6c9   : > { %v2245_v31 = vpop.eup %2244 }
 0x6ca   : > { %v1565_v25 = vmul.f32 %v2243_v55, %v1564_v61  ;;  %v1571_v62 = vmul.f32 %v2245_v31, %v1559_v56  ;;  %vm1577_vm5 = vweird.f32 %v2245_v31 }
 0x6cb   : > { %vm1578_vm7 = vmor %vm1576_vm6, %vm1577_vm5 }
 0x6cc   : > { %v1572_v63 = vmul.f32 %v2245_v31, %v1571_v62  ;;  %v1569_v1 = vsel %vm1568_vm4, %v2243_v55, %v1565_v25 }
 0x6cd   : > { %v1580_v5 = vmul.f32 %v1569_v1, %v1546_v38 }
 0x6ce   : > { %v1573_v2 = vmul.f32 0.5, %v1572_v63 }
 0x6cf   : > { %v1585_v9 = vmul.f32 %v2202_v4, %v1580_v5 }
 0x6d0   : > { %v1574_v3 = vsub.f32 1.5, %v1573_v2 }
 0x6d1   : > { %v2683_v13 = vadd.f32 %v2203_v8, %v1585_v9 }
 0x6d2   : > { %v1575_v6 = vmul.f32 %v2245_v31, %v1574_v3 }
 0x6d4   : > { %v1579_v7 = vsel %vm1578_vm7, %v2245_v31, %v1575_v6 }
 0x6d5   : > { %v1581_v0 = vmul.f32 %v1579_v7, %v1547_v43 }
 0x6d7   : > { %v1586_v10 = vmul.f32 %v2202_v4, %v1581_v0 }
 0x6d9   : > { %v2685_v14 = vadd.f32 %v2203_v8, %v1586_v10 }
 0x6db   : > { %v1592_v15 = vpack.c.bf16 %v2685_v14, %v2683_v13 }
 0x6dd   : > { %2104 = vmatmul.msk.bf16.vlgmr.msra.gmra.mxu1 %vm857_vm8, %v1592_v15 }
 0x75a   : > { %v1625_v17 = vpop.f32.mrf.mxu1 }
 0x75b   : > { %v2695_v18 = vadd.f32 %v2204_v16, %v1625_v17 }
 0x75d   : > { %v2698_v19 = vmul.f32 0.70710677, %v2695_v18 }
 0x75f   : > { %v1638_v20 = vand.u32 2147483647, %v2698_v19  ;;  %vm1634_vm9 = vcmp.ge.f32.partialorder %v2698_v19, 0.0 }
 0x761   : > { %v1640_v21 = vmul.f32 0.3275911, %v1638_v20  ;;  %v1692_v43 = vsub.f32 0.0, %v1638_v20 }
 0x762   : > { %v1627_v23 = vpop.f32.mrf.mxu1 }
 0x763   : > { %v1642_v24 = vadd.f32 1.0, %v1640_v21  ;;  %v2701_v42 = vadd.f32 %v2204_v16, %v1627_v23  ;;  %v1694_v53 = vmul.f32 %v1692_v43, %v1638_v20  ;;  %v2316_v23 = vmov -1.0  }
 0x765   : > { %2246 = vrcp.f32 %v1642_v24  ;;  %v2704_v59 = vmul.f32 0.70710677, %v2701_v42  ;;  %v1655_v32 = vand.u32 2147483648, %v1642_v24  ;;  %v1653_v34 = vand.u32 2147483647, %v1642_v24 }
 0x766   : > { %vm1649_vm12 = vweird.f32 %v1642_v24  ;;  %v1696_v60 = vmul.f32 1.442695, %v1694_v53 }
 0x767   : > { %v1639_v26 = vand.u32 2147483647, %v2704_v59  ;;  %v1656_v36 = vor.u32 1.1754944e-38, %v1655_v32  ;;  %vm1654_vm14 = vcmp.eq.f32.partialorder %v1653_v34, 8.507059e+37  ;;  %vm1635_vm2 = vcmp.ge.f32.partialorder %v2704_v59, 0.0 }
 0x768   : > { %v1631_v32 = vmul.f32 0.5, %v2701_v42  ;;  %v2205_v59 = vld [vmem:[%s754_s1] ss:$0 sm:$0xff] }
 0x769   : > { %v1641_v27 = vmul.f32 0.3275911, %v1639_v26  ;;  %v1693_v31 = vsub.f32 0.0, %v1639_v26 }
 0x76b   : > { %v2247_v12 = vpop.eup %2246  ;;  %v1643_v11 = vadd.f32 1.0, %v1641_v27  ;;  %v1695_v2 = vmul.f32 %v1693_v31, %v1639_v26 }
 0x76c   : > { %v1645_v28 = vmul.f32 %v2247_v12, %v1642_v24  ;;  %vm1650_vm11 = vweird.f32 %v2247_v12  ;;  %v1636_v24 = vsel %vm1634_vm9, 1.0, %v2316_v23 }
 0x76d   : > { %2248 = vrcp.f32 %v1643_v11  ;;  %vm1651_vm13 = vmor %vm1649_vm12, %vm1650_vm11  ;;  %v1670_v44 = vand.u32 2147483648, %v1643_v11  ;;  %v1668_v49 = vand.u32 2147483647, %v1643_v11  ;;  %vm1664_vm0 = vweird.f32 %v1643_v11 }
 0x76e   : > { %v1646_v30 = vsub.f32 1.0, %v1645_v28  ;;  %2250 = vpow2.f32 %v1696_v60  ;;  %v1698_v7 = vmul.f32 1.442695, %v1695_v2  ;;  %v1637_v28 = vsel %vm1635_vm2, 1.0, %v2316_v23 }
 0x76f   : > { %v1671_v56 = vor.u32 1.1754944e-38, %v1670_v44  ;;  %vm1669_vm1 = vcmp.eq.f32.partialorder %v1668_v49, 8.507059e+37 }
 0x770   : > { %v1647_v33 = vmul.f32 %v2247_v12, %v1646_v30  ;;  %2252 = vpow2.f32 %v1698_v7  ;;  %v1630_v30 = vmul.f32 0.5, %v2695_v18 }
 0x772   : > { %v1648_v47 = vadd.f32 %v2247_v12, %v1647_v33 }
 0x773   : > { %v2249_v37 = vpop.eup %2248 }
 0x774   : > { %v1652_v38 = vsel %vm1651_vm13, %v2247_v12, %v1648_v47  ;;  %v1660_v39 = vmul.f32 %v2249_v37, %v1643_v11  ;;  %vm1665_vm15 = vweird.f32 %v2249_v37  ;;  %v2251_v9 = vpop.eup %2250 }
 0x775   : > { %v1657_v52 = vsel %vm1654_vm14, %v1656_v36, %v1652_v38  ;;  %vm1666_vm10 = vmor %vm1664_vm0, %vm1665_vm15 }
 0x776   : > { %v1674_v41 = vmul.f32 1.0614054, %v1657_v52  ;;  %v1661_v45 = vsub.f32 1.0, %v1660_v39  ;;  %v2253_v21 = vpop.eup %2252 }
 0x778   : > { %v1676_v46 = vadd.f32 -1.4531521, %v1674_v41  ;;  %v1662_v22 = vmul.f32 %v2249_v37, %v1661_v45 }
 0x77a   : > { %v1678_v50 = vmul.f32 %v1676_v46, %v1657_v52  ;;  %v1663_v54 = vadd.f32 %v2249_v37, %v1662_v22 }
 0x77c   : > { %v1680_v55 = vadd.f32 1.4214138, %v1678_v50  ;;  %v1667_v57 = vsel %vm1666_vm10, %v2249_v37, %v1663_v54 }
 0x77d   : > { %v1672_v61 = vsel %vm1669_vm1, %v1671_v56, %v1667_v57 }
 0x77e   : > { %v1682_v58 = vmul.f32 %v1680_v55, %v1657_v52  ;;  %v1675_v25 = vmul.f32 1.0614054, %v1672_v61 }
 0x780   : > { %v1684_v62 = vadd.f32 -0.28449672, %v1682_v58  ;;  %v1677_v63 = vadd.f32 -1.4531521, %v1675_v25 }
 0x782   : > { %v1686_v1 = vmul.f32 %v1684_v62, %v1657_v52  ;;  %v1679_v3 = vmul.f32 %v1677_v63, %v1672_v61 }
 0x784   : > { %v1688_v4 = vadd.f32 0.2548296, %v1686_v1  ;;  %v1681_v5 = vadd.f32 1.4214138, %v1679_v3  ;;  %v2206_v1 = vld [vmem:[%s757_s23] ss:$0 sm:$0xff] }
 0x785   : > { %v2207_v3 = vld [vmem:[%s760_s5] ss:$0 sm:$0xff]  ;;  %s2820_s23 = sld [smem:[#allocation11_spill]] (!%p2122_p5) }
 0x786   : > { %v1690_v6 = vmul.f32 %v1688_v4, %v1657_v52  ;;  %v1683_v8 = vmul.f32 %v1681_v5, %v1672_v61 }
 0x788   : > { %v1700_v0 = vmul.f32 %v2251_v9, %v1690_v6  ;;  %v1685_v10 = vadd.f32 -0.28449672, %v1683_v8 }
 0x78a   : > { %v1687_v15 = vmul.f32 %v1685_v10, %v1672_v61  ;;  %v1702_v16 = vsub.f32 1.0, %v1700_v0 }
 0x78c   : > { %v1689_v17 = vadd.f32 0.2548296, %v1687_v15  ;;  %v1704_v26 = vmul.f32 %v1702_v16, %v1636_v24 }
 0x78e   : > { %v1691_v20 = vmul.f32 %v1689_v17, %v1672_v61  ;;  %v1706_v11 = vadd.f32 1.0, %v1704_v26 }
 0x790   : > { %v1701_v27 = vmul.f32 %v2253_v21, %v1691_v20  ;;  %v1708_v33 = vmul.f32 %v1706_v11, %v1630_v30 }
 0x792   : > { %v1703_v12 = vsub.f32 1.0, %v1701_v27 }
 0x794   : > { %v1705_v29 = vmul.f32 %v1703_v12, %v1637_v28 }
 0x796   : > { %v1707_v19 = vadd.f32 1.0, %v1705_v29 }
 0x798   : > { %v1709_v34 = vmul.f32 %v1707_v19, %v1631_v32 }
 0x79a   : > { %v1710_v35 = vpack.c.bf16 %v1709_v34, %v1708_v33 }
 0x79c   : > { %2121 = vmatmul.msk.bf16.vlgmr.msra.gmra.mxu2 %vm1747_vm3, %v1710_v35 }
 0x81f   : > { %v1760_v47 = vpop.f32.mrf.mxu2 }
 0x820   : > { %v1761_v36 = vadd.f32 %v2205_v59, %v1760_v47 }
 0x822   : > { %v1765_v37 = vadd.f32 %v1761_v36, %v2683_v13 }
 0x824   : > { %v1769_v38 = vsel %vm857_vm8, %v1765_v37, 0.0 }
 0x825   : > { %1770 = vadd.xlane.f32.xlu0 %v1769_v38 }
 0x827   : > { %v1762_v18 = vpop.f32.mrf.mxu2 }
 0x828   : > { %v1763_v42 = vadd.f32 %v2205_v59, %v1762_v18 }
 0x82a   : > { %v1766_v52 = vadd.f32 %v1763_v42, %v2685_v14 }
 0x82c   : > { %v1772_v39 = vsel %vm857_vm8, %v1766_v52, 0.0 }
 0x82d   : > { %1773 = vadd.xlane.f32.xlu2 %v1772_v39 }
 0x898   : > { %v1771_v40 = vpop.xlane.xlu0 %1770 }
 0x899   : > { %v1775_v41 = vmul.f32 %v1771_v40, %v2663_v51 }
 0x89b   : > { %v1777_v43 = vsub.f32 %v1765_v37, %v1775_v41 }
 0x89d   : > { %v1779_v45 = vmul.f32 %v1777_v43, %v1777_v43 }
 0x89f   : > { %v1781_v46 = vsel %vm857_vm8, %v1779_v45, 0.0 }
 0x8a0   : > { %v1774_v44 = vpop.xlane.xlu2 %1773  ;;  %1782 = vadd.xlane.f32.xlu1 %v1781_v46 }
 0x8a1   : > { %v1776_v13 = vmul.f32 %v1774_v44, %v2663_v51 }
 0x8a3   : > { %v1778_v22 = vsub.f32 %v1766_v52, %v1776_v13 }
 0x8a5   : > { %v1780_v49 = vmul.f32 %v1778_v22, %v1778_v22 }
 0x8a7   : > { %v1784_v48 = vsel %vm857_vm8, %v1780_v49, 0.0 }
 0x8a8   : > { %1785 = vadd.xlane.f32.xlu0 %v1784_v48 }
 0x913   : > { %v1783_v14 = vpop.xlane.xlu1 %1782 }
 0x914   : > { %v1787_v50 = vmul.f32 %v1783_v14, %v2663_v51 }
 0x916   : > { %v1789_v53 = vadd.f32 1e-05, %v1787_v50 }
 0x918   : > { %2254 = vrsqrt.f32 %v1789_v53  ;;  %vm1797_vm5 = vweird.f32 %v1789_v53 }
 0x91b   : > { %v1786_v54 = vpop.xlane.xlu0 %1785 }
 0x91c   : > { %v1788_v55 = vmul.f32 %v1786_v54, %v2663_v51 }
 0x91e   : > { %v2255_v56 = vpop.eup %2254  ;;  %v1790_v57 = vadd.f32 1e-05, %v1788_v55 }
 0x91f   : > { %v1792_v58 = vmul.f32 %v2255_v56, %v1789_v53  ;;  %vm1798_vm4 = vweird.f32 %v2255_v56 }
 0x920   : > { %2256 = vrsqrt.f32 %v1790_v57  ;;  %vm1799_vm6 = vmor %vm1797_vm5, %vm1798_vm4  ;;  %vm1807_vm11 = vweird.f32 %v1790_v57 }
 0x921   : > { %v1793_v60 = vmul.f32 %v2255_v56, %v1792_v58 }
 0x923   : > { %v1794_v61 = vmul.f32 0.5, %v1793_v60 }
 0x925   : > { %v1795_v31 = vsub.f32 1.5, %v1794_v61 }
 0x926   : > { %v2257_v25 = vpop.eup %2256 }
 0x927   : > { %v1796_v62 = vmul.f32 %v2255_v56, %v1795_v31  ;;  %v1802_v63 = vmul.f32 %v2257_v25, %v1790_v57  ;;  %vm1808_vm7 = vweird.f32 %v2257_v25 }
 0x928   : > { %vm1809_vm12 = vmor %vm1807_vm11, %vm1808_vm7 }
 0x929   : > { %v1800_v51 = vsel %vm1799_vm6, %v2255_v56, %v1796_v62  ;;  %v1803_v2 = vmul.f32 %v2257_v25, %v1802_v63 }
 0x92a   : > { %v1811_v4 = vmul.f32 %v1800_v51, %v1777_v43 }
 0x92b   : > { %v1804_v5 = vmul.f32 0.5, %v1803_v2 }
 0x92c   : > { %v1816_v6 = vmul.f32 %v2206_v1, %v1811_v4 }
 0x92d   : > { %v1805_v7 = vsub.f32 1.5, %v1804_v5 }
 0x92e   : > { %v1821_v8 = vadd.f32 %v2207_v3, %v1816_v6 }
 0x92f   : > { %v1806_v9 = vmul.f32 %v2257_v25, %v1805_v7 }
 0x930   : > { %1823 = vst.msk [vmem:[#allocation2] sm:$0xff] %vm857_vm8, %v1821_v8 }
 0x931   : > { %v1810_v0 = vsel %vm1809_vm12, %v2257_v25, %v1806_v9 }
 0x932   : > { %v1812_v10 = vmul.f32 %v1810_v0, %v1778_v22 }
 0x934   : > { %v1817_v15 = vmul.f32 %v2206_v1, %v1812_v10  ;;  %1828 = sbr.rel (%p2122_p5) target bundleno = 2631 (0xa47), region = 104 }
 0x936   : > { %v1822_v16 = vadd.f32 %v2207_v3, %v1817_v15 }
 0x938   : > { %1824 = vst.msk [vmem:[#allocation2 + $0x8] sm:$0xff] %vm857_vm8, %v1822_v16 }
 0x939   : > { %v1829_v17 = vld [vmem:[%s2820_s23] sm:$0xff]  ;;  %v2317_v20 = vmov 0   ;;  %v1830_v21 = vld [vmem:[%s2820_s23 + $0x8] sm:$0xff]  ;;  %v1860_v23 = vld [vmem:[%s2821_s2 + $0x18] sm:$0xff]  ;;  %vm1867_vm13 = vcmask 1041409   ;;  %vm1891_vm14 = vcmask 9216  }
 0x93a   : > { %2258 = vset.pattern.permute.xlu0 %v2317_v20  ;;  %1883 = vmatpush.msra.mxu0 %v1860_v23  ;;  %v1859_v24 = vld [vmem:[%s2821_s2 + $0x10] sm:$0xff]  ;;  %v1858_v26 = vld [vmem:[%s2821_s2 + $0x8] sm:$0xff]  ;;  %v1857_v27 = vld [vmem:[%s2821_s2] sm:$0xff] }
 0x93b   : > { %1833 = vperm.xlu0 %2258, %v1829_v17   ;;  %v2259_v40 = vld [vmem:[%s2822_s27] ss:$0 sm:$0xff] }
 0x93c   : > { %1884 = vmatpush.msra.mxu0 %v1859_v24 }
 0x93e   : > { %1885 = vmatpush.msra.mxu0 %v1858_v26 }
 0x940   : > { %1886 = vmatpush.msra.mxu0 %v1857_v27 }
 0x943   : > { %1838 = vperm.xlu0 %2258, %v1830_v21  }
 0x9ad   : > { %v1834_v12 = vpop.permute.xlu0 %1833 }
 0x9ae   : > { %v1841_v28 = vmul.f32 %v1834_v12, %v1821_v8 }
 0x9b0   : > { %v1843_v11 = vsel %vm857_vm8, %v1841_v28, 0.0 }
 0x9b1   : > { %v1844_v29 = vrot.slane %v1843_v11, 4 }
 0x9b3   : > { %v1845_v30 = vadd.f32 %v1844_v29, %v1843_v11 }
 0x9b5   : > { %v1839_v32 = vpop.permute.xlu0 %1838  ;;  %v1846_v33 = vrot.slane %v1845_v30, 2 }
 0x9b6   : > { %v1842_v19 = vmul.f32 %v1839_v32, %v1822_v16 }
 0x9b7   : > { %v1847_v59 = vadd.f32 %v1846_v33, %v1845_v30 }
 0x9b8   : > { %v1850_v34 = vsel %vm857_vm8, %v1842_v19, 0.0 }
 0x9b9   : > { %v1851_v35 = vrot.slane %v1850_v34, 4  ;;  %v1848_v37 = vrot.slane %v1847_v59, 1 }
 0x9bb   : > { %v1852_v47 = vadd.f32 %v1851_v35, %v1850_v34  ;;  %v1849_v42 = vadd.f32 %v1848_v37, %v1847_v59 }
 0x9bd   : > { %v1853_v36 = vrot.slane %v1852_v47, 2 }
 0x9bf   : > { %v1854_v38 = vadd.f32 %v1853_v36, %v1852_v47 }
 0x9c1   : > { %v1855_v18 = vrot.slane %v1854_v38, 1 }
 0x9c3   : > { %v1856_v52 = vadd.f32 %v1855_v18, %v1854_v38 }
 0x9c5   : > { %v1868_v39 = vsel %vm1867_vm13, %v1856_v52, %v1849_v42 }
 0x9c6   : > { %2123 = vmatmul.msk.f32.vlgmr.msra.gmra.mxu0 %vm857_vm8, %v1868_v39 }
 0xa43   : > { %v1888_v41 = vpop.f32.mrf.mxu0 }
 0xa44   : > { %v1889_v43 = vadd.f32 %v2259_v40, %v1888_v41 }
 0xa46   : > { %1892 = vst.msk [vmem:[#allocation3] sm:$0x3] %vm1891_vm14, %v1889_v43 }
 0xa47 PF: > { %p2146_p6 = scmp.eq.s32.totalorder %s2425_s30, 1  ;;  %s2318_s3 = smov [#allocation3]  }
 0xa48   : > { %s1899_s5 = sshll.u32 %s2318_s3, 4  ;;  %s2823_s7 = sld [smem:[#allocation16_spill]]  ;;  %s1900_s5 = int_to_ptr.vmem [resolvable:$true] %s1899_s5 }
 0xa4e   : > { %s1901_s25 = sshll.u32 %s2823_s7, 4  ;;  %s1902_s25 = int_to_ptr.hbm [resolvable:$true] %s1901_s25 }
 0xa4f   : > { %2143 = dma.vmem_to_hbm [thread:$0]  (%p2146_p6), %s1900_s5, 32, %s1902_s25, [#allocation4]  }
 0xa50   : > { %2293 = dma.done.wait (%p2146_p6), [#allocation4], 32  }
 0xa51   : > { %2295 = vsyncadd (%p2146_p6), [#allocation4], 4294967264 }
 0xa52 PF: > { %s2824_s29 = sld [smem:[#allocation6_spill]] }
 0xa58   : > { %s30_s0 = sadd.s32 1, %s2824_s29  }
 0xa59   : > { %p27_p7 = scmp.ge.s32.totalorder %s30_s0, 4  }
 0xa5b   :  { %29 = sbr.rel (!%p27_p7) target bundleno = 12 (0xc), region = 164 }
 0xa60   :  { %1915 = vsyncpa [#allocation4], 1 }
 0xa61   :  { %1917 = vsyncpa [#allocation4 + $0x1], 1 }

</bundles_post_ra>
